<compile_context>
chip_gen: v5e
topology: v5e:2x2
jax: 0.10.0
libtpu: 0.0.40
codegen_flags: <defaults>
</compile_context>

<pallas_src>
import jax
import jax.numpy as jnp
from jax.experimental import pallas as pl
from jax.experimental.pallas import tpu as pltpu

_LANE = 128


def _softmax_ref(x):
    """Pure-JAX reference (identical math to the PyTorch module)."""
    x_max = jnp.max(x, axis=0, keepdims=True)
    x_exp = jnp.exp(x - x_max)
    return x_exp / jnp.sum(x_exp, axis=0, keepdims=True)


def _softmax_stable_kernel(x_ref, o_ref):
    # Compute in f32 regardless of input dtype (robust column sums; v5e has no bf16 VPU/EUP).
    x = x_ref[...].astype(jnp.float32)
    x_max = jnp.max(x, axis=0, keepdims=True)            # XLU sublane reduce
    x_exp = jnp.exp(x - x_max)                            # EUP
    partition = jnp.sum(x_exp, axis=0, keepdims=True)     # XLU sublane reduce
    # Exact normalization: the kernel is HBM-bound at these tile sizes, so the exact
    # divide hides under the DMA and columns sum to 1 within f32 ulps.
    o_ref[...] = (x_exp / partition).astype(o_ref.dtype)


def _round_up(v, m):
    return -(-v // m) * m


def softmax_stable(x, *, target_tile_bytes=2 * 1024 * 1024,
                   min_pallas_bytes=256 * 1024):
    """Softmax over dim 0 (numerically stable), matching SoftmaxStable.forward."""
    orig_shape = x.shape
    orig_dtype = x.dtype
    total_bytes = x.size * x.dtype.itemsize

    # Small-input / 1-D fast path: launch + a tiny (or 1-lane-wide) DMA dominates,
    # a fused XLA softmax is strictly faster there.
    if x.ndim < 2 or total_bytes < min_pallas_bytes:
        return _softmax_ref(x).astype(orig_dtype)

    # Fold trailing dims into one lane axis; dim 0 is the reduction axis.
    x2 = x.reshape(x.shape[0], -1)
    N, D = x2.shape

    # Generation-aware VMEM limit: ~75% of physical (48 MiB on v7x's 64 MiB, 96 MiB on
    # v5e/v6e's 128 MiB) — leaves headroom for compiler scratch/spill.
    try:
        vmem_cap = int(pltpu.get_tpu_info().vmem_capacity_bytes)
    except Exception:  # pragma: no cover - conservative fallback
        vmem_cap = 64 * 1024 * 1024
    vmem_limit = min((vmem_cap * 3) // 4, 96 * 1024 * 1024)

    # Tile-width selection from a byte target. Live VMEM per grid step is roughly
    # 7 f32-equivalent tiles: double-buffered input + double-buffered output + the
    # f32 upcast, exp(x - max) and the result before store.
    live_f32_tiles = 7
    col_bytes_f32 = max(1, N) * 4
    max_tile_bytes = max(1, vmem_limit // live_f32_tiles)
    tile_bytes = min(target_tile_bytes, max_tile_bytes)
    max_td = (tile_bytes // col_bytes_f32) // _LANE * _LANE

    if max_td < _LANE:
        # TODO(synk): very tall inputs (one (N,128) f32 column tile no longer fits VMEM)
        # need a two-pass / online-softmax kernel with an 'arbitrary' N grid axis; fall
        # back to the fused XLA softmax instead of risking a VMEM OOM.
        return _softmax_ref(x).astype(orig_dtype)

    # Keep >= ~4 column tiles so the "parallel" axis can be split across v7x's two
    # TensorCores with enough tiles each for double-buffering; never go below 128 lanes
    # and never wider than D rounded up to a lane multiple.
    td_occupancy = _round_up(max(1, -(-D // 4)), _LANE)
    TD = max(_LANE, min(max_td, td_occupancy, _round_up(D, _LANE)))

    grid = (pl.cdiv(D, TD),)  # ragged last block handled by masked stores

    out = pl.pallas_call(
        _softmax_stable_kernel,
        out_shape=jax.ShapeDtypeStruct((N, D), orig_dtype),
        grid=grid,
        in_specs=[pl.BlockSpec((N, TD), lambda j: (0, j))],
        out_specs=pl.BlockSpec((N, TD), lambda j: (0, j)),
        compiler_params=pltpu.CompilerParams(
            dimension_semantics=("parallel",),   # column tiles are independent
            vmem_limit_bytes=vmem_limit,
        ),
    )(x2)

    return out.reshape(orig_shape)


if __name__ == "__main__":
    key = jax.random.PRNGKey(0)
    k0, k1, k2 = jax.random.split(key, 3)

    # 1) Nominal module shape (seq=8, hidden=32): small-input fast path.
    x_small = jax.random.normal(k0, (8, 32), dtype=jnp.float32)
    out_small = jax.block_until_ready(softmax_stable(x_small))
    assert out_small.shape == x_small.shape and out_small.dtype == x_small.dtype
    assert jnp.allclose(out_small, _softmax_ref(x_small), atol=1e-6, rtol=1e-6)

    # 2) Pallas path: big enough to pass the fast-path threshold; D=640 with a 256-lane
    #    tile gives a 3-tile grid whose last block is ragged (masked store path).
    x_big = jax.random.normal(k1, (512, 640), dtype=jnp.float32)
    out_big = jax.block_until_ready(softmax_stable(x_big))
    ref_big = _reference = _softmax_ref(x_big)
    assert out_big.shape == x_big.shape and out_big.dtype == x_big.dtype
    assert jnp.allclose(out_big, ref_big, atol=1e-6, rtol=1e-6)
    assert jnp.allclose(jnp.sum(out_big, axis=0),
                        jnp.ones((640,), jnp.float32), atol=1e-5)

    # 3) Pallas path with trailing-dim folding (3-D input, softmax still over dim 0).
    x_3d = jax.random.normal(k2, (64, 8, 160), dtype=jnp.float32)
    out_3d = jax.block_until_ready(softmax_stable(x_3d))
    assert out_3d.shape == x_3d.shape
    assert jnp.allclose(out_3d, _softmax_ref(x_3d), atol=1e-6, rtol=1e-6)

    print("KERNEL_OK")
</pallas_src>

<mosaic_0001>
module attributes {stable_mosaic.version = 11 : i64} {
  func.func @_softmax_stable_kernel(%arg0: i32, %arg1: memref<512x256xf32, #tpu.memory_space<vmem>>, %arg2: memref<512x256xf32, #tpu.memory_space<vmem>>) attributes {dimension_semantics = [#tpu.dimension_semantics<parallel>], iteration_bounds = array<i64: 3>, scalar_prefetch = 0 : i64, scratch_operands = 0 : i64, tpu.core_type = #tpu.core_type<tc>, window_params = [{transform_indices = @transform_0, window_bounds = array<i64: 512, 256>}, {transform_indices = @transform_1, window_bounds = array<i64: 512, 256>}]} {
    %c0 = arith.constant 0 : index
    %c0_0 = arith.constant 0 : index
    %0 = vector.load %arg1[%c0, %c0_0] : memref<512x256xf32, #tpu.memory_space<vmem>>, vector<512x256xf32>
    %cst = arith.constant dense<0xFF800000> : vector<256xf32>
    %1 = vector.multi_reduction <maximumf>, %0, %cst [0] : vector<512x256xf32> to vector<256xf32>
    %2 = vector.shape_cast %1 : vector<256xf32> to vector<1x256xf32>
    %3 = vector.broadcast %2 : vector<1x256xf32> to vector<512x256xf32>
    %4 = arith.subf %0, %3 : vector<512x256xf32>
    %5 = math.exp %4 : vector<512x256xf32>
    %cst_1 = arith.constant dense<0.000000e+00> : vector<256xf32>
    %6 = vector.multi_reduction <add>, %5, %cst_1 [0] : vector<512x256xf32> to vector<256xf32>
    %7 = vector.shape_cast %6 : vector<256xf32> to vector<1x256xf32>
    %8 = vector.broadcast %7 : vector<1x256xf32> to vector<512x256xf32>
    %9 = arith.divf %5, %8 : vector<512x256xf32>
    %c0_2 = arith.constant 0 : index
    %c0_3 = arith.constant 0 : index
    %10 = vector.load %arg2[%c0_2, %c0_3] : memref<512x256xf32, #tpu.memory_space<vmem>>, vector<512x256xf32>
    tpu.vector_store %arg2[%c0_2, %c0_3], %9 {strides = array<i32>} : memref<512x256xf32, #tpu.memory_space<vmem>>, vector<512x256xf32>,
    return
  }
  func.func @transform_0(%arg0: i32) -> (i32, i32) {
    %c0_i32 = arith.constant 0 : i32
    %c0_i32_0 = arith.constant 0 : i32
    return %c0_i32, %arg0 : i32, i32
  }
  func.func @transform_1(%arg0: i32) -> (i32, i32) {
    %c0_i32 = arith.constant 0 : i32
    %c0_i32_0 = arith.constant 0 : i32
    return %c0_i32, %arg0 : i32, i32
  }
}

</mosaic_0001>

<bundles_post_ra>
// kernel: tpu_custom_call.1
= control target key start
LH: loop header
LB: loop body
LE: loop exit
PB: predicated region body
PF: predicated region fallthrough
CT: control target
= control target key end

     0   :  { %6 = vsyncpa [#allocation3], 0  ;;  %s3550_s0 = inlined_call_operand.hbm [shape: f32[512,640], index: 0, kind: input, shape index: {}]   ;;  %s3551_s1 = inlined_call_operand.hbm [shape: f32[512,640], index: 1, kind: output, shape index: {}]  }
   0x1   :  { %8 = vsyncpa [#allocation3 + $0x1], 0 }
   0x2   :  { %9 = vsyncpa [#allocation4], 0 }
   0x3   :  { %11 = vsyncpa [#allocation4 + $0x1], 0  ;;  %s1826_s6 = smov 0   ;;  %s1828_s7 = smov 0  }
   0x4   :  { %s1830_s8 = smov 0   ;;  %s1832_s9 = smov 0  }
   0x5 LB: > { %s1847_s10 = sadd.s32 4294967295, %s1808_s9   ;;  %s1324_s11 = sadd.s32 4294967294, %s1808_s9   ;;  %s1808_s9 = sphi %s1832_s9, %s3971_s9   ;;  %s1804_s8 = sphi %s1830_s8, %s3970_s8   ;;  %s1800_s7 = sphi %s1828_s7, %s3969_s7   ;;  %s1796_s6 = sphi %s1826_s6, %s3968_s6  }
   0x6   : > { %s1851_s12 = sadd.s32 1, %s1808_s9   ;;  %s24_s13 = sadd.s32 1, %s1804_s8 }
   0x7   : > { %s21_s14 = ssub.s32 %s1808_s9, %s1851_s12  ;;  %p31_p0 = scmp.ne.s32.totalorder %s1804_s8, %s1800_s7 }
   0x8   : > { %p22_p1 = scmp.eq.s32.totalorder %s21_s14, 0  ;;  %p32_p2 = scmp.eq.s32.totalorder %s1808_s9, 0 }
   0x9   : > { %p37_p3 = scmp.ne.s32.totalorder %s1800_s7, %s1796_s6  ;;  %p38_p4 = scmp.eq.s32.totalorder %s1847_s10, 0 }
   0xa   : > { %s1863_s15 = scalar_select %p22_p1, %s1804_s8, %s24_s13  }
   0xb   : > { %p33_p5 = por %p32_p2, %p31_p0  ;;  %p1865_p6 = por %p38_p4, %p37_p3 }
   0xc   : > { %p61_p7 = scmp.eq.s32.totalorder %s1847_s10, 2  ;;  %p67_p8 = scmp.eq.s32.totalorder %s1324_s11, 2 }
   0xd   : > { %p1326_p11 = scmp.ge.s32.totalorder %s1808_s9, 3 }
   0xe   : > { %p1870_p9 = por %p61_p7, %p31_p0  ;;  %p1874_p10 = por %p67_p8, %p37_p3 }
   0xf   : > { %83 = sbr.rel (%p1326_p11) target bundleno = 57 (0x39), region = 16 }
  0x14   : > { %86 = sbr.rel (!%p33_p5) target bundleno = 57 (0x39), region = 20  ;;  %s87_s19 = sand.u32 (%p33_p5), 1, %s1804_s8  }
  0x15   : > { %s1328_s20 = sshll.u32 (%p33_p5), %s1808_s9, 1  ;;  %s1327_s21 = sshll.u32 (%p33_p5), %s87_s19, 10 }
  0x16   : > { %s93_s22 = ssub.s32 (%p33_p5), 5, %s1328_s20  ;;  %s1884_s26 = scalar_lea.sflag (%p33_p5), [#allocation3], %s87_s19 }
  0x17   : > { %p94_p12 = scmp.lt.s32.totalorder (%p33_p5), %s93_s22, 2  ;;  %s91_s27 = scalar_lea.vmem (%p33_p5), [#allocation2], %s1327_s21 }
  0x19   : > { %s3973_s22 = smov (!%p94_p12, %s93_s22), 2 }
  0x1a   : > { %s1329_s23 = sshll.u32 %s3973_s22, 9 }
  0x1b   : > { %s97_s24 = ssub.s32 1024, %s1329_s23 }
  0x1c   : > { %s98_s25 = sshll.u32 %s97_s24, 4 }
  0x1d   : > { %99 = vsyncadd %s1884_s26, %s98_s25  ;;  %p1887_p13 = scmp.ne.s32.totalorder %s1329_s23, 0  ;;  %s1348_s29 = sshll.u32 %s1808_s9, 4 }
  0x1e   : > { %s102_s3 = scalar_lea.hbm %s3550_s0, %s1348_s29  ;;  %s1332_s4 = sshll.u32 %s3973_s22, 3 }
  0x1f   : > { %s105_s5 = sshll.u32 %s102_s3, 4  ;;  %s1896_s11 = sshll.u32 %s91_s27, 4  ;;  %s1898_s5 = int_to_ptr.hbm [resolvable:$true] %s105_s5  ;;  %s108_s11 = int_to_ptr.vmem [resolvable:$true] %s1896_s11 }
  0x20   : > { %s1350_s13 = sshll.u32 %s3973_s22, 13  ;;  %s1692_s14 = sshra.s32 %s1898_s5, 4  ;;  %s1693_s14 = int_to_ptr.hbm [resolvable:$true] %s1692_s14 }
  0x21   : > { %s1694_s19 = sshrl.u32 %s1350_s13, 4  ;;  %s1703_s24 = scalar_lea.hbm %s3550_s0, 2560 }
  0x22   : > { %s1699_s20 = scalar_lea.hbm %s1693_s14, %s1694_s19  ;;  %p1704_p3 = scmp.lt.s32.totalorder %s1693_s14, %s3550_s0 }
  0x23   : > { %p1700_p0 = scmp.ne.s32.totalorder %s1693_s14, %s1699_s20  ;;  %p1705_p4 = scmp.lt.s32.totalorder %s1703_s24, %s1699_s20 }
  0x25   : > { %p1701_p1 = pnand %p1700_p0, %p1887_p13  ;;  %p1706_p5 = por %p1705_p4, %p1704_p3 }
  0x27   : > { %p1702_p2 = pneg %p1701_p1 }
  0x29   : > { %p1707_p7 = pnand %p1706_p5, %p1702_p2 }
  0x2b   : > { %1710 = shalt.err (!%p1707_p7)
}
  0x2c   : > { %s1711_s29 = sshra.s32 %s108_s11, 4  ;;  %s1810_s2 = smov [#allocation2]   ;;  %s1712_s29 = int_to_ptr.vmem [resolvable:$true] %s1711_s29 }
  0x2d   : > { %s1718_s30 = scalar_lea.vmem %s1712_s29, %s1694_s19  ;;  %s1722_s3 = scalar_lea.vmem %s1810_s2, 2048 }
  0x2e   : > { %p1719_p8 = scmp.ne.s32.totalorder %s1712_s29, %s1718_s30  ;;  %p1724_p0 = scmp.lt.s32.totalorder %s1722_s3, %s1718_s30 }
  0x30   : > { %p1720_p11 = pnand %p1719_p8, %p1887_p13 }
  0x32   : > { %p1721_p12 = pneg %p1720_p11 }
  0x34   : > { %p1726_p1 = pnand %p1724_p0, %p1721_p12 }
  0x36   : > { %1729 = shalt.err (!%p1726_p1)
}
  0x37   : > { %s1811_s14 = smov 640   ;;  %s1812_s20 = smov 256  }
  0x38   : > { %113 = dma.hbm_to_vmem [thread:$0]  (%p1887_p13), %s1898_s5, %s1350_s13, %s108_s11, %s1884_s26, %s1811_s14, %s1812_s20, %s1332_s4  }
  0x39 PF: > { %p1335_p2 = scmp.ge.s32.totalorder %s1808_s9, 1  ;;  %p115_p3 = scmp.lt.s32.totalorder %s1808_s9, 4 }
  0x3b   : > { %p116_p4 = pnand %p1335_p2, %p115_p3 }
  0x3d   : > { %119 = sbr.rel (%p116_p4) target bundleno = 504 (0x1f8), region = 24 }
  0x42   : > { %s1930_s19 = sand.u32 1, %s1800_s7  }
  0x43   : > { %s1336_s28 = sshll.u32 %s1930_s19, 10  ;;  %s122_s21 = scalar_lea.sflag [#allocation3], %s1930_s19 }
  0x44   : > { %s1936_s22 = scalar_lea.vmem [#allocation2], %s1336_s28 }
  0x45   : > { %1787 = dma.done.wait (%p1865_p6), %s122_s21, 16384  }
  0x46   : > { %1789 = vsyncadd (%p1865_p6), %s122_s21, 4294950912  ;;  %v1943_v0 = vld [vmem:[%s1936_s22] sm:$0xff]  ;;  %v1946_v1 = vld [vmem:[%s1936_s22 + $0x10] sm:$0xff]  ;;  %s3046_s16 = scalar_lea.vmem [#allocation5], %s1336_s28  ;;  %s1228_s26 = scalar_lea.sflag [#allocation4], %s1930_s19 }
  0x47   : > { %v1949_v2 = vld [vmem:[%s1936_s22 + $0x20] sm:$0xff]  ;;  %v1952_v3 = vld [vmem:[%s1936_s22 + $0x30] sm:$0xff]  ;;  %v2047_v48 = vld [vmem:[%s1936_s22 + $0x8] sm:$0xff]  ;;  %s1339_s4 = sshll.u32 (%p1870_p9), %s1847_s10, 1 }
  0x48   : > { %v1955_v4 = vld [vmem:[%s1936_s22 + $0x40] sm:$0xff]  ;;  %v1958_v5 = vld [vmem:[%s1936_s22 + $0x50] sm:$0xff]  ;;  %v283_v6 = vmax.f32 %v1943_v0, %v1949_v2  ;;  %v284_v8 = vmax.f32 %v1946_v1, %v1952_v3  ;;  %3699 = vst [vmem:[#allocation25_spill] sm:$0xff] %v2047_v48  ;;  %v2050_v49 = vld [vmem:[%s1936_s22 + $0x18] sm:$0xff]  ;;  %s1236_s5 = ssub.s32 (%p1870_p9), 5, %s1339_s4 }
  0x49   : > { %v1963_v7 = vld [vmem:[%s1936_s22 + $0x60] sm:$0xff]  ;;  %v1968_v9 = vld [vmem:[%s1936_s22 + $0x70] sm:$0xff]  ;;  %3700 = vst [vmem:[#allocation26_spill] sm:$0xff] %v2050_v49  ;;  %v2054_v51 = vld [vmem:[%s1936_s22 + $0x28] sm:$0xff]  ;;  %p1237_p6 = scmp.lt.s32.totalorder (%p1870_p9), %s1236_s5, 2 }
  0x4a   : > { %v285_v10 = vmax.f32 %v283_v6, %v1955_v4  ;;  %v1972_v11 = vld [vmem:[%s1936_s22 + $0x80] sm:$0xff]  ;;  %v286_v12 = vmax.f32 %v284_v8, %v1958_v5  ;;  %v1976_v13 = vld [vmem:[%s1936_s22 + $0x90] sm:$0xff]  ;;  %3701 = vst [vmem:[#allocation27_spill] sm:$0xff] %v2054_v51  ;;  %v2057_v52 = vld [vmem:[%s1936_s22 + $0x38] sm:$0xff]  ;;  %v352_v57 = vmax.f32 %v2047_v48, %v2054_v51 }
  0x4b   : > { %v1980_v15 = vld [vmem:[%s1936_s22 + $0xa0] sm:$0xff]  ;;  %v1984_v17 = vld [vmem:[%s1936_s22 + $0xb0] sm:$0xff]  ;;  %3702 = vst [vmem:[#allocation28_spill] sm:$0xff] %v2057_v52  ;;  %v2060_v53 = vld [vmem:[%s1936_s22 + $0x48] sm:$0xff]  ;;  %v353_v58 = vmax.f32 %v2050_v49, %v2057_v52 }
  0x4c   : > { %v287_v14 = vmax.f32 %v285_v10, %v1963_v7  ;;  %3682 = vst [vmem:[#allocation8_spill] sm:$0xff] %v1980_v15  ;;  %v288_v16 = vmax.f32 %v286_v12, %v1968_v9  ;;  %v1988_v19 = vld [vmem:[%s1936_s22 + $0xc0] sm:$0xff]  ;;  %v1992_v21 = vld [vmem:[%s1936_s22 + $0xd0] sm:$0xff]  ;;  %v2067_v56 = vld [vmem:[%s1936_s22 + $0x58] sm:$0xff]  ;;  %v354_v8 = vmax.f32 %v352_v57, %v2060_v53 }
  0x4d   : > { %3683 = vst [vmem:[#allocation9_spill] sm:$0xff] %v1984_v17  ;;  %v1996_v23 = vld [vmem:[%s1936_s22 + $0xe0] sm:$0xff]  ;;  %v2000_v25 = vld [vmem:[%s1936_s22 + $0xf0] sm:$0xff]  ;;  %v2078_v61 = vld [vmem:[%s1936_s22 + $0x68] sm:$0xff]  ;;  %v355_v10 = vmax.f32 %v353_v58, %v2067_v56 }
  0x4e   : > { %v289_v18 = vmax.f32 %v287_v14, %v1972_v11  ;;  %3684 = vst [vmem:[#allocation10_spill] sm:$0xff] %v1988_v19  ;;  %v290_v20 = vmax.f32 %v288_v16, %v1976_v13  ;;  %v2004_v27 = vld [vmem:[%s1936_s22 + $0x100] sm:$0xff]  ;;  %v2008_v29 = vld [vmem:[%s1936_s22 + $0x110] sm:$0xff]  ;;  %v2081_v62 = vld [vmem:[%s1936_s22 + $0x78] sm:$0xff] }
  0x4f   : > { %3685 = vst [vmem:[#allocation11_spill] sm:$0xff] %v1992_v21  ;;  %v2012_v31 = vld [vmem:[%s1936_s22 + $0x120] sm:$0xff]  ;;  %v2016_v33 = vld [vmem:[%s1936_s22 + $0x130] sm:$0xff]  ;;  %v2094_v16 = vld [vmem:[%s1936_s22 + $0x88] sm:$0xff] }
  0x50   : > { %v291_v22 = vmax.f32 %v289_v18, %v1980_v15  ;;  %3686 = vst [vmem:[#allocation12_spill] sm:$0xff] %v1996_v23  ;;  %v292_v24 = vmax.f32 %v290_v20, %v1984_v17  ;;  %v2020_v35 = vld [vmem:[%s1936_s22 + $0x140] sm:$0xff]  ;;  %v2024_v37 = vld [vmem:[%s1936_s22 + $0x150] sm:$0xff]  ;;  %v2097_v18 = vld [vmem:[%s1936_s22 + $0x98] sm:$0xff] }
  0x51   : > { %3687 = vst [vmem:[#allocation13_spill] sm:$0xff] %v2000_v25  ;;  %v2028_v39 = vld [vmem:[%s1936_s22 + $0x160] sm:$0xff]  ;;  %v2032_v41 = vld [vmem:[%s1936_s22 + $0x170] sm:$0xff]  ;;  %v2225_v52 = vld [vmem:[%s1936_s22 + $0x198] sm:$0xff] }
  0x52   : > { %v293_v26 = vmax.f32 %v291_v22, %v1988_v19  ;;  %3688 = vst [vmem:[#allocation14_spill] sm:$0xff] %v2004_v27  ;;  %v294_v28 = vmax.f32 %v292_v24, %v1992_v21  ;;  %v2036_v43 = vld [vmem:[%s1936_s22 + $0x180] sm:$0xff]  ;;  %v2039_v44 = vld [vmem:[%s1936_s22 + $0x190] sm:$0xff]  ;;  %v356_v24 = vmax.f32 %v354_v8, %v2078_v61  ;;  %v2241_v49 = vld [vmem:[%s1936_s22 + $0x1b8] sm:$0xff] }
  0x53   : > { %3689 = vst [vmem:[#allocation15_spill] sm:$0xff] %v2008_v29  ;;  %v2043_v46 = vld [vmem:[%s1936_s22 + $0x1a0] sm:$0xff]  ;;  %v2063_v54 = vld [vmem:[%s1936_s22 + $0x1b0] sm:$0xff]  ;;  %v250_v17 = vld [vmem:[%s1936_s22 + $0x2f8] sm:$0xff] }
  0x54   : > { %v295_v30 = vmax.f32 %v293_v26, %v1996_v23  ;;  %3690 = vst [vmem:[#allocation16_spill] sm:$0xff] %v2012_v31  ;;  %v296_v32 = vmax.f32 %v294_v28, %v2000_v25  ;;  %v2074_v59 = vld [vmem:[%s1936_s22 + $0x1c0] sm:$0xff]  ;;  %v2084_v63 = vld [vmem:[%s1936_s22 + $0x1d0] sm:$0xff]  ;;  %v357_v26 = vmax.f32 %v355_v10, %v2081_v62  ;;  %v236_v23 = vld [vmem:[%s1936_s22 + $0x288] sm:$0xff] }
  0x55   : > { %3691 = vst [vmem:[#allocation17_spill] sm:$0xff] %v2016_v33  ;;  %v2090_v12 = vld [vmem:[%s1936_s22 + $0x1e0] sm:$0xff]  ;;  %v2100_v20 = vld [vmem:[%s1936_s22 + $0x1f0] sm:$0xff] }
  0x56   : > { %v297_v34 = vmax.f32 %v295_v30, %v2004_v27  ;;  %3692 = vst [vmem:[#allocation18_spill] sm:$0xff] %v2020_v35  ;;  %v298_v36 = vmax.f32 %v296_v32, %v2008_v29  ;;  %v2106_v28 = vld [vmem:[%s1936_s22 + $0x200] sm:$0xff]  ;;  %v2110_v32 = vld [vmem:[%s1936_s22 + $0xa8] sm:$0xff]  ;;  %v2132_v57 = vld [vmem:[%s1936_s22 + $0x230] sm:$0xff] }
  0x57   : > { %3693 = vst [vmem:[#allocation19_spill] sm:$0xff] %v2024_v37  ;;  %v2138_v8 = vld [vmem:[%s1936_s22 + $0x240] sm:$0xff]  ;;  %v2228_v51 = vld [vmem:[%s1936_s22 + $0x2f0] sm:$0xff] }
  0x58   : > { %v299_v38 = vmax.f32 %v297_v34, %v2012_v31  ;;  %3694 = vst [vmem:[#allocation20_spill] sm:$0xff] %v2028_v39  ;;  %v300_v40 = vmax.f32 %v298_v36, %v2016_v33  ;;  %v2113_v34 = vld [vmem:[%s1936_s22 + $0xb8] sm:$0xff]  ;;  %v2116_v36 = vld [vmem:[%s1936_s22 + $0x210] sm:$0xff] }
  0x59   : > { %3695 = vst [vmem:[#allocation21_spill] sm:$0xff] %v2032_v41  ;;  %v2244_v48 = vld [vmem:[%s1936_s22 + $0x310] sm:$0xff] }
  0x5a   : > { %v301_v42 = vmax.f32 %v299_v38, %v2020_v35  ;;  %3696 = vst [vmem:[#allocation22_spill] sm:$0xff] %v2036_v43  ;;  %v302_v45 = vmax.f32 %v300_v40, %v2024_v37  ;;  %v358_v40 = vmax.f32 %v356_v24, %v2094_v16  ;;  %v2148_v24 = vld [vmem:[%s1936_s22 + $0x250] sm:$0xff]  ;;  %v228_v37 = vld [vmem:[%s1936_s22 + $0x248] sm:$0xff] }
  0x5b   : > { %3697 = vst [vmem:[#allocation23_spill] sm:$0xff] %v2039_v44  ;;  %v2317_v35 = vld [vmem:[%s1936_s22 + $0x3f0] sm:$0xff] }
  0x5c   : > { %3698 = vst [vmem:[#allocation24_spill] sm:$0xff] %v2043_v46  ;;  %v303_v47 = vmax.f32 %v301_v42, %v2028_v39  ;;  %v304_v50 = vmax.f32 %v302_v45, %v2032_v41  ;;  %v359_v42 = vmax.f32 %v357_v26, %v2097_v18  ;;  %v2122_v45 = vld [vmem:[%s1936_s22 + $0x220] sm:$0xff] }
  0x5d   : > { %3703 = vst [vmem:[#allocation29_spill] sm:$0xff] %v2060_v53  ;;  %v2212_v53 = vld [vmem:[%s1936_s22 + $0x2d0] sm:$0xff]  ;;  %v2293_v41 = vld [vmem:[%s1936_s22 + $0x3a0] sm:$0xff] }
  0x5e   : > { %3704 = vst [vmem:[#allocation30_spill] sm:$0xff] %v2063_v54  ;;  %v305_v55 = vmax.f32 %v303_v47, %v2036_v43  ;;  %v306_v60 = vmax.f32 %v304_v50, %v2039_v44  ;;  %v2126_v50 = vld [vmem:[%s1936_s22 + $0xc8] sm:$0xff] }
  0x5f   : > { %3705 = vst [vmem:[#allocation31_spill] sm:$0xff] %v2067_v56  ;;  %v2209_v56 = vld [vmem:[%s1936_s22 + $0x178] sm:$0xff] }
  0x60   : > { %3706 = vst [vmem:[#allocation32_spill] sm:$0xff] %v2074_v59  ;;  %v307_v6 = vmax.f32 %v305_v55, %v2043_v46  ;;  %v308_v14 = vmax.f32 %v306_v60, %v2063_v54  ;;  %v2129_v55 = vld [vmem:[%s1936_s22 + $0xd8] sm:$0xff]  ;;  %v360_v60 = vmax.f32 %v358_v40, %v2110_v32  ;;  %v2154_v40 = vld [vmem:[%s1936_s22 + $0x260] sm:$0xff] }
  0x61   : > { %3707 = vst [vmem:[#allocation33_spill] sm:$0xff] %v2078_v61  ;;  %v2196_v61 = vld [vmem:[%s1936_s22 + $0x2b0] sm:$0xff]  ;;  %v2275_v46 = vld [vmem:[%s1936_s22 + $0x360] sm:$0xff] }
  0x62   : > { %3708 = vst [vmem:[#allocation34_spill] sm:$0xff] %v2081_v62  ;;  %v309_v22 = vmax.f32 %v307_v6, %v2074_v59  ;;  %v310_v30 = vmax.f32 %v308_v14, %v2084_v63  ;;  %v361_v6 = vmax.f32 %v359_v42, %v2113_v34  ;;  %v2142_v14 = vld [vmem:[%s1936_s22 + $0xe8] sm:$0xff]  ;;  %v2193_v62 = vld [vmem:[%s1936_s22 + $0x158] sm:$0xff] }
  0x63   : > { %3709 = vst [vmem:[#allocation35_spill] sm:$0xff] %v2084_v63  ;;  %v2270_v63 = vld [vmem:[%s1936_s22 + $0x350] sm:$0xff] }
  0x64   : > { %3710 = vst [vmem:[#allocation36_spill] sm:$0xff] %v2090_v12  ;;  %v311_v38 = vmax.f32 %v309_v22, %v2090_v12  ;;  %v312_v47 = vmax.f32 %v310_v30, %v2100_v20  ;;  %v2145_v22 = vld [vmem:[%s1936_s22 + $0xf8] sm:$0xff]  ;;  %v362_v30 = vmax.f32 %v360_v60, %v2126_v50 }
  0x65   : > { %3711 = vst [vmem:[#allocation37_spill] sm:$0xff] %v2094_v16  ;;  %v2180_v16 = vld [vmem:[%s1936_s22 + $0x290] sm:$0xff] }
  0x66   : > { %3712 = vst [vmem:[#allocation38_spill] sm:$0xff] %v2097_v18  ;;  %v313_v58 = vmax.f32 %v311_v38, %v2106_v28  ;;  %v314_v10 = vmax.f32 %v312_v47, %v2116_v36  ;;  %v363_v38 = vmax.f32 %v361_v6, %v2129_v55  ;;  %v2158_v47 = vld [vmem:[%s1936_s22 + $0x108] sm:$0xff]  ;;  %v364_v60 = vmax.f32 %v362_v30, %v2142_v14  ;;  %v2177_v18 = vld [vmem:[%s1936_s22 + $0x138] sm:$0xff] }
  0x67   : > { %3713 = vst [vmem:[#allocation39_spill] sm:$0xff] %v2100_v20  ;;  %v2258_v20 = vld [vmem:[%s1936_s22 + $0x330] sm:$0xff] }
  0x68   : > { %3714 = vst [vmem:[#allocation40_spill] sm:$0xff] %v2106_v28  ;;  %v315_v26 = vmax.f32 %v313_v58, %v2122_v45  ;;  %v316_v42 = vmax.f32 %v314_v10, %v2132_v57  ;;  %v365_v6 = vmax.f32 %v363_v38, %v2145_v22  ;;  %v366_v30 = vmax.f32 %v364_v60, %v2158_v47  ;;  %v214_v28 = vld [vmem:[%s1936_s22 + $0x1d8] sm:$0xff] }
  0x69   : > { %3715 = vst [vmem:[#allocation41_spill] sm:$0xff] %v2110_v32  ;;  %v2164_v32 = vld [vmem:[%s1936_s22 + $0x270] sm:$0xff] }
  0x6a   : > { %3716 = vst [vmem:[#allocation42_spill] sm:$0xff] %v2113_v34  ;;  %v2161_v34 = vld [vmem:[%s1936_s22 + $0x118] sm:$0xff]  ;;  %v317_v58 = vmax.f32 %v315_v26, %v2138_v8  ;;  %v318_v10 = vmax.f32 %v316_v42, %v2148_v24 }
  0x6b   : > { %3717 = vst [vmem:[#allocation43_spill] sm:$0xff] %v2126_v50  ;;  %v2174_v50 = vld [vmem:[%s1936_s22 + $0x128] sm:$0xff]  ;;  %v367_v38 = vmax.f32 %v365_v6, %v2161_v34 }
  0x6c   : > { %3718 = vst [vmem:[#allocation44_spill] sm:$0xff] %v2129_v55  ;;  %v2170_v55 = vld [vmem:[%s1936_s22 + $0x280] sm:$0xff]  ;;  %v319_v26 = vmax.f32 %v317_v58, %v2154_v40  ;;  %v320_v42 = vmax.f32 %v318_v10, %v2164_v32  ;;  %v368_v60 = vmax.f32 %v366_v30, %v2174_v50 }
  0x6d   : > { %3719 = vst [vmem:[#allocation45_spill] sm:$0xff] %v2142_v14  ;;  %v2190_v14 = vld [vmem:[%s1936_s22 + $0x148] sm:$0xff]  ;;  %v369_v6 = vmax.f32 %v367_v38, %v2177_v18 }
  0x6e   : > { %3720 = vst [vmem:[#allocation46_spill] sm:$0xff] %v2145_v22  ;;  %v2186_v22 = vld [vmem:[%s1936_s22 + $0x2a0] sm:$0xff]  ;;  %v321_v58 = vmax.f32 %v319_v26, %v2170_v55  ;;  %v322_v10 = vmax.f32 %v320_v42, %v2180_v16  ;;  %v370_v30 = vmax.f32 %v368_v60, %v2190_v14 }
  0x6f   : > { %3721 = vst [vmem:[#allocation47_spill] sm:$0xff] %v2158_v47  ;;  %v2206_v47 = vld [vmem:[%s1936_s22 + $0x168] sm:$0xff]  ;;  %v371_v38 = vmax.f32 %v369_v6, %v2193_v62 }
  0x70   : > { %3722 = vst [vmem:[#allocation48_spill] sm:$0xff] %v2161_v34  ;;  %v2202_v34 = vld [vmem:[%s1936_s22 + $0x2c0] sm:$0xff]  ;;  %v323_v26 = vmax.f32 %v321_v58, %v2186_v22  ;;  %v324_v42 = vmax.f32 %v322_v10, %v2196_v61  ;;  %v372_v60 = vmax.f32 %v370_v30, %v2206_v47 }
  0x71   : > { %3723 = vst [vmem:[#allocation49_spill] sm:$0xff] %v2174_v50  ;;  %v2222_v50 = vld [vmem:[%s1936_s22 + $0x188] sm:$0xff]  ;;  %v373_v6 = vmax.f32 %v371_v38, %v2209_v56 }
  0x72   : > { %3724 = vst [vmem:[#allocation50_spill] sm:$0xff] %v2177_v18  ;;  %v2218_v18 = vld [vmem:[%s1936_s22 + $0x2e0] sm:$0xff]  ;;  %v325_v58 = vmax.f32 %v323_v26, %v2202_v34  ;;  %v326_v10 = vmax.f32 %v324_v42, %v2212_v53  ;;  %v374_v30 = vmax.f32 %v372_v60, %v2222_v50 }
  0x73   : > { %3725 = vst [vmem:[#allocation51_spill] sm:$0xff] %v2190_v14  ;;  %v2238_v14 = vld [vmem:[%s1936_s22 + $0x1a8] sm:$0xff]  ;;  %v375_v38 = vmax.f32 %v373_v6, %v2225_v52  ;;  %v2264_v6 = vld [vmem:[%s1936_s22 + $0x340] sm:$0xff] }
  0x74   : > { %3726 = vst [vmem:[#allocation52_spill] sm:$0xff] %v2193_v62  ;;  %v2234_v62 = vld [vmem:[%s1936_s22 + $0x300] sm:$0xff]  ;;  %v327_v26 = vmax.f32 %v325_v58, %v2218_v18  ;;  %v328_v42 = vmax.f32 %v326_v10, %v2228_v51  ;;  %v376_v58 = vmax.f32 %v374_v30, %v2238_v14  ;;  %v216_v10 = vld [vmem:[%s1936_s22 + $0x1e8] sm:$0xff] }
  0x75   : > { %3727 = vst [vmem:[#allocation53_spill] sm:$0xff] %v2206_v47  ;;  %v2254_v47 = vld [vmem:[%s1936_s22 + $0x1c8] sm:$0xff]  ;;  %v377_v60 = vmax.f32 %v375_v38, %v2241_v49 }
  0x76   : > { %3728 = vst [vmem:[#allocation54_spill] sm:$0xff] %v2209_v56  ;;  %v2250_v56 = vld [vmem:[%s1936_s22 + $0x320] sm:$0xff]  ;;  %v329_v12 = vmax.f32 %v327_v26, %v2234_v62  ;;  %v378_v54 = vmax.f32 %v376_v58, %v2254_v47  ;;  %v220_v38 = vld [vmem:[%s1936_s22 + $0x208] sm:$0xff] }
  0x77   : > { %3729 = vst [vmem:[#allocation55_spill] sm:$0xff] %v2222_v50  ;;  %v218_v50 = vld [vmem:[%s1936_s22 + $0x1f8] sm:$0xff]  ;;  %v379_v26 = vmax.f32 %v377_v60, %v214_v28  ;;  %v2285_v58 = vld [vmem:[%s1936_s22 + $0x380] sm:$0xff]  ;;  %v2289_v60 = vld [vmem:[%s1936_s22 + $0x390] sm:$0xff] }
  0x78   : > { %3730 = vst [vmem:[#allocation56_spill] sm:$0xff] %v2225_v52  ;;  %v330_v52 = vmax.f32 %v328_v42, %v2244_v48  ;;  %v331_v59 = vmax.f32 %v329_v12, %v2250_v56  ;;  %v222_v42 = vld [vmem:[%s1936_s22 + $0x218] sm:$0xff]  ;;  %v380_v44 = vmax.f32 %v378_v54, %v216_v10  ;;  %v2299_v10 = vld [vmem:[%s1936_s22 + $0x3b0] sm:$0xff] }
  0x79   : > { %3731 = vst [vmem:[#allocation57_spill] sm:$0xff] %v2238_v14  ;;  %v381_v12 = vmax.f32 %v379_v26, %v218_v50  ;;  %v226_v50 = vld [vmem:[%s1936_s22 + $0x238] sm:$0xff] }
  0x7a   : > { %3732 = vst [vmem:[#allocation58_spill] sm:$0xff] %v2241_v49  ;;  %v332_v30 = vmax.f32 %v330_v52, %v2258_v20  ;;  %v2281_v49 = vld [vmem:[%s1936_s22 + $0x370] sm:$0xff]  ;;  %v333_v14 = vmax.f32 %v331_v59, %v2264_v6  ;;  %v224_v59 = vld [vmem:[%s1936_s22 + $0x228] sm:$0xff] }
  0x7b   : > { %3733 = vst [vmem:[#allocation59_spill] sm:$0xff] %v2254_v47  ;;  %v382_v47 = vmax.f32 %v380_v44, %v220_v38  ;;  %v383_v43 = vmax.f32 %v381_v12, %v222_v42  ;;  %v2307_v44 = vld [vmem:[%s1936_s22 + $0x3d0] sm:$0xff]  ;;  %v2311_v12 = vld [vmem:[%s1936_s22 + $0x3e0] sm:$0xff] }
  0x7c   : > { %v334_v28 = vmax.f32 %v332_v30, %v2270_v63  ;;  %v335_v52 = vmax.f32 %v333_v14, %v2275_v46  ;;  %v2303_v30 = vld [vmem:[%s1936_s22 + $0x3c0] sm:$0xff] }
  0x7d   : > { %v384_v38 = vmax.f32 %v382_v47, %v224_v59  ;;  %v385_v42 = vmax.f32 %v383_v43, %v226_v50  ;;  %v232_v59 = vld [vmem:[%s1936_s22 + $0x268] sm:$0xff] }
  0x7e   : > { %v336_v54 = vmax.f32 %v334_v28, %v2281_v49  ;;  %v337_v26 = vmax.f32 %v335_v52, %v2285_v58  ;;  %v230_v52 = vld [vmem:[%s1936_s22 + $0x258] sm:$0xff] }
  0x7f   : > { %v387_v43 = vmax.f32 %v385_v42, %v230_v52 }
  0x80   : > { %v338_v39 = vmax.f32 %v336_v54, %v2289_v60  ;;  %v339_v14 = vmax.f32 %v337_v26, %v2293_v41  ;;  %v386_v26 = vmax.f32 %v384_v38, %v228_v37  ;;  %v240_v38 = vld [vmem:[%s1936_s22 + $0x2a8] sm:$0xff] }
  0x82   : > { %v340_v28 = vmax.f32 %v338_v39, %v2299_v10  ;;  %v341_v54 = vmax.f32 %v339_v14, %v2303_v30  ;;  %v234_v39 = vld [vmem:[%s1936_s22 + $0x278] sm:$0xff]  ;;  %v388_v29 = vmax.f32 %v386_v26, %v232_v59 }
  0x83   : > { %v389_v27 = vmax.f32 %v387_v43, %v234_v39  ;;  %v238_v14 = vld [vmem:[%s1936_s22 + $0x298] sm:$0xff]  ;;  %v248_v39 = vld [vmem:[%s1936_s22 + $0x2e8] sm:$0xff] }
  0x84   : > { %v342_v33 = vmax.f32 %v340_v28, %v2307_v44  ;;  %v343_v31 = vmax.f32 %v341_v54, %v2311_v12  ;;  %v390_v54 = vmax.f32 %v388_v29, %v236_v23  ;;  %v254_v29 = vld [vmem:[%s1936_s22 + $0x318] sm:$0xff] }
  0x85   : > { %v391_v21 = vmax.f32 %v389_v27, %v238_v14  ;;  %v252_v27 = vld [vmem:[%s1936_s22 + $0x308] sm:$0xff] }
  0x86   : > { %v344_v47 = vmax.f32 %v342_v33, %v2317_v35  ;;  %v242_v33 = vld [vmem:[%s1936_s22 + $0x2b8] sm:$0xff]  ;;  %v392_v52 = vmax.f32 %v390_v54, %v240_v38 }
  0x87   : > { %v393_v19 = vmax.f32 %v391_v21, %v242_v33 }
  0x88   : > { %v345_v50 = vmax.f32 %v343_v31, %v344_v47  ;;  %v244_v31 = vld [vmem:[%s1936_s22 + $0x2c8] sm:$0xff]  ;;  %v246_v47 = vld [vmem:[%s1936_s22 + $0x2d8] sm:$0xff] }
  0x89   : > { %v394_v43 = vmax.f32 %v392_v52, %v244_v31  ;;  %v395_v59 = vmax.f32 %v393_v19, %v246_v47  ;;  %v260_v52 = vld [vmem:[%s1936_s22 + $0x348] sm:$0xff] }
  0x8a   : > { %v346_v25 = vrot.slane %v345_v50, 4 }
  0x8b   : > { %v397_v23 = vmax.f32 %v395_v59, %v250_v17 }
  0x8c   : > { %v347_v28 = vmax.f32 %v345_v50, %v346_v25  ;;  %v396_v25 = vmax.f32 %v394_v43, %v248_v39 }
  0x8e   : > { %v348_v37 = vrot.slane %v347_v28, 2  ;;  %v398_v14 = vmax.f32 %v396_v25, %v252_v27  ;;  %v256_v27 = vld [vmem:[%s1936_s22 + $0x328] sm:$0xff] }
  0x90   : > { %v349_v42 = vmax.f32 %v347_v28, %v348_v37  ;;  %v399_v28 = vmax.f32 %v397_v23, %v254_v29  ;;  %v400_v43 = vmax.f32 %v398_v14, %v256_v27  ;;  %v264_v14 = vld [vmem:[%s1936_s22 + $0x368] sm:$0xff] }
  0x92   : > { %v350_v26 = vrot.slane %v349_v42, 1  ;;  %v402_v23 = vmax.f32 %v400_v43, %v260_v52  ;;  %v270_v43 = vld [vmem:[%s1936_s22 + $0x398] sm:$0xff] }
  0x94   : > { %v2333_v15 = vmax.f32 %v349_v42, %v350_v26  ;;  %v258_v26 = vld [vmem:[%s1936_s22 + $0x338] sm:$0xff] }
  0x95   : > { %v401_v39 = vmax.f32 %v399_v28, %v258_v26  ;;  %v262_v42 = vld [vmem:[%s1936_s22 + $0x358] sm:$0xff]  ;;  %v404_v26 = vmax.f32 %v402_v23, %v264_v14 }
  0x96   : > { %v421_v50 = vsub.f32 %v1943_v0, %v2333_v15  ;;  %v423_v21 = vsub.f32 %v1946_v1, %v2333_v15  ;;  %v425_v29 = vsub.f32 %v1949_v2, %v2333_v15  ;;  %v427_v59 = vsub.f32 %v1952_v3, %v2333_v15  ;;  %v266_v3 = vld [vmem:[%s1936_s22 + $0x378] sm:$0xff] }
  0x97   : > { %v429_v25 = vsub.f32 %v1955_v4, %v2333_v15  ;;  %v431_v2 = vsub.f32 %v1958_v5, %v2333_v15  ;;  %v403_v27 = vmax.f32 %v401_v39, %v262_v42  ;;  %v433_v28 = vsub.f32 %v1963_v7, %v2333_v15  ;;  %v278_v1 = vld [vmem:[%s1936_s22 + $0x3d8] sm:$0xff] }
  0x98   : > { %v549_v47 = vmul.f32 1.442695, %v421_v50  ;;  %v553_v31 = vmul.f32 1.442695, %v423_v21  ;;  %v557_v33 = vmul.f32 1.442695, %v425_v29  ;;  %v435_v4 = vsub.f32 %v1968_v9, %v2333_v15 }
  0x99   : > { %v561_v50 = vmul.f32 1.442695, %v427_v59  ;;  %v565_v21 = vmul.f32 1.442695, %v429_v25  ;;  %v569_v52 = vmul.f32 1.442695, %v431_v2  ;;  %v405_v5 = vmax.f32 %v403_v27, %v266_v3 }
  0x9a   : > { %1397 = vpow2.f32 %v549_v47  ;;  %v268_v47 = vld [vmem:[%s1936_s22 + $0x388] sm:$0xff]  ;;  %v437_v7 = vsub.f32 %v1972_v11, %v2333_v15  ;;  %v439_v9 = vsub.f32 %v1976_v13, %v2333_v15  ;;  %v577_v25 = vmul.f32 1.442695, %v435_v4  ;;  %v3734_v11 = vld [vmem:[#allocation8_spill] sm:$0xff]  ;;  %v282_v0 = vld [vmem:[%s1936_s22 + $0x3f8] sm:$0xff] }
  0x9b   : > { %1399 = vpow2.f32 %v553_v31  ;;  %v406_v59 = vmax.f32 %v404_v26, %v268_v47  ;;  %v407_v23 = vmax.f32 %v405_v5, %v270_v43  ;;  %v272_v2 = vld [vmem:[%s1936_s22 + $0x3a8] sm:$0xff]  ;;  %v441_v27 = vsub.f32 %v3734_v11, %v2333_v15 }
  0x9c   : > { %1401 = vpow2.f32 %v557_v33  ;;  %v573_v33 = vmul.f32 1.442695, %v433_v28  ;;  %v581_v3 = vmul.f32 1.442695, %v437_v7  ;;  %v3735_v28 = vld [vmem:[#allocation9_spill] sm:$0xff]  ;;  %v3736_v7 = vld [vmem:[#allocation10_spill] sm:$0xff] }
  0x9d   : > { %1403 = vpow2.f32 %v561_v50  ;;  %v274_v50 = vld [vmem:[%s1936_s22 + $0x3b8] sm:$0xff]  ;;  %v443_v13 = vsub.f32 %v3735_v28, %v2333_v15  ;;  %v585_v4 = vmul.f32 1.442695, %v439_v9  ;;  %v276_v43 = vld [vmem:[%s1936_s22 + $0x3c8] sm:$0xff]  ;;  %v589_v28 = vmul.f32 1.442695, %v441_v27 }
  0x9e   : > { %1405 = vpow2.f32 %v565_v21  ;;  %v409_v47 = vmax.f32 %v407_v23, %v274_v50 }
  0x9f   : > { %1407 = vpow2.f32 %v569_v52  ;;  %v408_v52 = vmax.f32 %v406_v59, %v272_v2 }
  0xa0   : > { %v2422_v31 = vpop.eup %1397  ;;  %1409 = vpow2.f32 %v573_v33  ;;  %v445_v33 = vsub.f32 %v3736_v7, %v2333_v15  ;;  %v411_v2 = vmax.f32 %v409_v47, %v278_v1 }
  0xa1   : > { %v2425_v42 = vpop.eup %1399  ;;  %1411 = vpow2.f32 %v577_v25  ;;  %v593_v25 = vmul.f32 1.442695, %v443_v13  ;;  %v410_v23 = vmax.f32 %v408_v52, %v276_v43 }
  0xa2   : > { %v2429_v39 = vpop.eup %1401  ;;  %v805_v29 = vadd.f32 %v2425_v42, %v2422_v31  ;;  %1413 = vpow2.f32 %v581_v3  ;;  %v3738_v3 = vld [vmem:[#allocation12_spill] sm:$0xff]  ;;  %v597_v7 = vmul.f32 1.442695, %v445_v33  ;;  %v413_v52 = vmax.f32 %v411_v2, %v282_v0 }
  0xa3   : > { %v2437_v14 = vpop.eup %1403  ;;  %1415 = vpow2.f32 %v585_v4  ;;  %v449_v27 = vsub.f32 %v3738_v3, %v2333_v15 }
  0xa4   : > { %v806_v21 = vadd.f32 %v2429_v39, %v805_v29  ;;  %v2444_v26 = vpop.eup %1405  ;;  %v3737_v29 = vld [vmem:[#allocation11_spill] sm:$0xff]  ;;  %1417 = vpow2.f32 %v589_v28 }
  0xa5   : > { %v2449_v11 = vpop.eup %1407  ;;  %v447_v38 = vsub.f32 %v3737_v29, %v2333_v15  ;;  %v3739_v29 = vld [vmem:[#allocation13_spill] sm:$0xff]  ;;  %1419 = vpow2.f32 %v593_v25  ;;  %v605_v33 = vmul.f32 1.442695, %v449_v27 }
  0xa6   : > { %v807_v5 = vadd.f32 %v2437_v14, %v806_v21  ;;  %v2456_v59 = vpop.eup %1409  ;;  %v280_v21 = vld [vmem:[%s1936_s22 + $0x3e8] sm:$0xff]  ;;  %1421 = vpow2.f32 %v597_v7 }
  0xa7   : > { %v2461_v17 = vpop.eup %1411  ;;  %v601_v1 = vmul.f32 1.442695, %v447_v38  ;;  %v412_v13 = vmax.f32 %v410_v23, %v280_v21  ;;  %v3745_v23 = vld [vmem:[#allocation16_spill] sm:$0xff] }
  0xa8   : > { %v808_v9 = vadd.f32 %v2444_v26, %v807_v5  ;;  %v451_v5 = vsub.f32 %v3739_v29, %v2333_v15  ;;  %v2468_v4 = vpop.eup %1413  ;;  %v457_v2 = vsub.f32 %v3745_v23, %v2333_v15  ;;  %v3751_v23 = vld [vmem:[#allocation19_spill] sm:$0xff] }
  0xa9   : > { %v2471_v43 = vpop.eup %1415  ;;  %1423 = vpow2.f32 %v601_v1  ;;  %v414_v25 = vmax.f32 %v412_v13, %v413_v52  ;;  %v463_v54 = vsub.f32 %v3751_v23, %v2333_v15 }
  0xaa   : > { %v809_v50 = vadd.f32 %v2449_v11, %v808_v9  ;;  %3740 = vst [vmem:[#allocation8_spill] sm:$0xff] %v2471_v43  ;;  %v3741_v9 = vld [vmem:[#allocation14_spill] sm:$0xff]  ;;  %v2476_v29 = vpop.eup %1417  ;;  %v609_v38 = vmul.f32 1.442695, %v451_v5  ;;  %1425 = vpow2.f32 %v605_v33  ;;  %v621_v33 = vmul.f32 1.442695, %v457_v2 }
  0xab   : > { %v453_v3 = vsub.f32 %v3741_v9, %v2333_v15  ;;  %3742 = vst [vmem:[#allocation9_spill] sm:$0xff] %v2476_v29  ;;  %v415_v5 = vrot.slane %v414_v25, 4 }
  0xac   : > { %v810_v37 = vadd.f32 %v2456_v59, %v809_v50  ;;  %v3743_v50 = vld [vmem:[#allocation15_spill] sm:$0xff]  ;;  %1427 = vpow2.f32 %v609_v38 }
  0xad   : > { %v455_v19 = vsub.f32 %v3743_v50, %v2333_v15  ;;  %v613_v21 = vmul.f32 1.442695, %v453_v3 }
  0xae   : > { %v811_v47 = vadd.f32 %v2461_v17, %v810_v37  ;;  %v2481_v37 = vpop.eup %1419 }
  0xaf   : > { %3744 = vst [vmem:[#allocation10_spill] sm:$0xff] %v2481_v37  ;;  %v2486_v7 = vpop.eup %1421  ;;  %v617_v1 = vmul.f32 1.442695, %v455_v19  ;;  %1429 = vpow2.f32 %v613_v21  ;;  %v416_v19 = vmax.f32 %v414_v25, %v415_v5 }
  0xb0   : > { %v812_v28 = vadd.f32 %v2468_v4, %v811_v47  ;;  %3746 = vst [vmem:[#allocation11_spill] sm:$0xff] %v2486_v7  ;;  %v3747_v47 = vld [vmem:[#allocation17_spill] sm:$0xff]  ;;  %v2491_v52 = vpop.eup %1423 }
  0xb1   : > { %v459_v9 = vsub.f32 %v3747_v47, %v2333_v15  ;;  %3748 = vst [vmem:[#allocation12_spill] sm:$0xff] %v2491_v52  ;;  %1431 = vpow2.f32 %v617_v1  ;;  %v633_v1 = vmul.f32 1.442695, %v463_v54 }
  0xb2   : > { %v813_v0 = vadd.f32 %v2471_v43, %v812_v28  ;;  %v3749_v28 = vld [vmem:[#allocation18_spill] sm:$0xff]  ;;  %1433 = vpow2.f32 %v621_v33 }
  0xb3   : > { %v461_v50 = vsub.f32 %v3749_v28, %v2333_v15  ;;  %v625_v38 = vmul.f32 1.442695, %v459_v9  ;;  %v3755_v28 = vld [vmem:[#allocation21_spill] sm:$0xff]  ;;  %v417_v9 = vrot.slane %v416_v19, 2 }
  0xb4   : > { %v814_v27 = vadd.f32 %v2476_v29, %v813_v0  ;;  %v2496_v0 = vpop.eup %1425 }
  0xb5   : > { %3750 = vst [vmem:[#allocation13_spill] sm:$0xff] %v2496_v0  ;;  %v629_v21 = vmul.f32 1.442695, %v461_v50  ;;  %1435 = vpow2.f32 %v625_v38  ;;  %v418_v54 = vmax.f32 %v416_v19, %v417_v9 }
  0xb6   : > { %v815_v13 = vadd.f32 %v2481_v37, %v814_v27  ;;  %v2501_v27 = vpop.eup %1427  ;;  %v3753_v37 = vld [vmem:[#allocation20_spill] sm:$0xff] }
  0xb7   : > { %3752 = vst [vmem:[#allocation14_spill] sm:$0xff] %v2501_v27  ;;  %v465_v29 = vsub.f32 %v3753_v37, %v2333_v15  ;;  %1437 = vpow2.f32 %v629_v21 }
  0xb8   : > { %v816_v3 = vadd.f32 %v2486_v7, %v815_v13  ;;  %v2506_v13 = vpop.eup %1429  ;;  %v467_v7 = vsub.f32 %v3755_v28, %v2333_v15  ;;  %1439 = vpow2.f32 %v633_v1 }
  0xb9   : > { %3754 = vst [vmem:[#allocation15_spill] sm:$0xff] %v2506_v13  ;;  %v2511_v5 = vpop.eup %1431  ;;  %v637_v37 = vmul.f32 1.442695, %v465_v29 }
  0xba   : > { %v817_v47 = vadd.f32 %v2491_v52, %v816_v3  ;;  %3756 = vst [vmem:[#allocation16_spill] sm:$0xff] %v2511_v5  ;;  %v3757_v3 = vld [vmem:[#allocation22_spill] sm:$0xff]  ;;  %v2516_v33 = vpop.eup %1433  ;;  %v641_v38 = vmul.f32 1.442695, %v467_v7  ;;  %v419_v7 = vrot.slane %v418_v54, 1 }
  0xbb   : > { %v469_v23 = vsub.f32 %v3757_v3, %v2333_v15  ;;  %3758 = vst [vmem:[#allocation17_spill] sm:$0xff] %v2516_v33  ;;  %1441 = vpow2.f32 %v637_v37  ;;  %v3763_v3 = vld [vmem:[#allocation30_spill] sm:$0xff] }
  0xbc   : > { %v818_v2 = vadd.f32 %v2496_v0, %v817_v47  ;;  %v3759_v47 = vld [vmem:[#allocation23_spill] sm:$0xff]  ;;  %1443 = vpow2.f32 %v641_v38 }
  0xbd   : > { %v471_v0 = vsub.f32 %v3759_v47, %v2333_v15  ;;  %v645_v21 = vmul.f32 1.442695, %v469_v23 }
  0xbe   : > { %v819_v25 = vadd.f32 %v2501_v27, %v818_v2  ;;  %v2521_v2 = vpop.eup %1435  ;;  %v3761_v27 = vld [vmem:[#allocation24_spill] sm:$0xff] }
  0xbf   : > { %3760 = vst [vmem:[#allocation18_spill] sm:$0xff] %v2521_v2  ;;  %v473_v52 = vsub.f32 %v3761_v27, %v2333_v15  ;;  %v649_v1 = vmul.f32 1.442695, %v471_v0  ;;  %1445 = vpow2.f32 %v645_v21  ;;  %v2540_v0 = vmax.f32 %v418_v54, %v419_v7  ;;  %v3773_v7 = vld [vmem:[#allocation25_spill] sm:$0xff] }
  0xc0   : > { %v820_v50 = vadd.f32 %v2506_v13, %v819_v25  ;;  %v2526_v25 = vpop.eup %1437  ;;  %v475_v13 = vsub.f32 %v3763_v3, %v2333_v15 }
  0xc1   : > { %3762 = vst [vmem:[#allocation19_spill] sm:$0xff] %v2526_v25  ;;  %v2531_v9 = vpop.eup %1439  ;;  %v653_v27 = vmul.f32 1.442695, %v473_v52  ;;  %1447 = vpow2.f32 %v649_v1  ;;  %v3770_v52 = vld [vmem:[#allocation39_spill] sm:$0xff] }
  0xc2   : > { %v821_v28 = vadd.f32 %v2511_v5, %v820_v50  ;;  %3764 = vst [vmem:[#allocation20_spill] sm:$0xff] %v2531_v9  ;;  %v3765_v50 = vld [vmem:[#allocation32_spill] sm:$0xff]  ;;  %v2536_v37 = vpop.eup %1441  ;;  %v657_v38 = vmul.f32 1.442695, %v475_v13  ;;  %v483_v21 = vsub.f32 %v3770_v52, %v2333_v15 }
  0xc3   : > { %v477_v47 = vsub.f32 %v3765_v50, %v2333_v15  ;;  %3766 = vst [vmem:[#allocation21_spill] sm:$0xff] %v2536_v37  ;;  %v2545_v5 = vpop.eup %1443  ;;  %1449 = vpow2.f32 %v653_v27  ;;  %v3771_v50 = vld [vmem:[#allocation40_spill] sm:$0xff] }
  0xc4   : > { %v822_v29 = vadd.f32 %v2516_v33, %v821_v28  ;;  %v3767_v28 = vld [vmem:[#allocation35_spill] sm:$0xff]  ;;  %3769 = vst [vmem:[#allocation22_spill] sm:$0xff] %v2545_v5  ;;  %1451 = vpow2.f32 %v657_v38 }
  0xc5   : > { %v479_v33 = vsub.f32 %v3767_v28, %v2333_v15  ;;  %v2552_v13 = vpop.eup %1445  ;;  %v422_v28 = vsub.f32 %v3773_v7, %v2540_v0 }
  0xc6   : > { %v823_v19 = vadd.f32 %v2521_v2, %v822_v29  ;;  %v3768_v29 = vld [vmem:[#allocation36_spill] sm:$0xff]  ;;  %3772 = vst [vmem:[#allocation23_spill] sm:$0xff] %v2552_v13 }
  0xc7   : > { %v481_v3 = vsub.f32 %v3768_v29, %v2333_v15  ;;  %v665_v54 = vmul.f32 1.442695, %v479_v33  ;;  %v2559_v27 = vpop.eup %1447  ;;  %v3776_v33 = vld [vmem:[#allocation28_spill] sm:$0xff] }
  0xc8   : > { %v824_v23 = vadd.f32 %v2526_v25, %v823_v19  ;;  %v661_v19 = vmul.f32 1.442695, %v477_v47  ;;  %v485_v25 = vsub.f32 %v3771_v50, %v2333_v15  ;;  %v673_v47 = vmul.f32 1.442695, %v483_v21  ;;  %v3775_v50 = vld [vmem:[#allocation27_spill] sm:$0xff] }
  0xc9   : > { %v428_v43 = vsub.f32 %v3776_v33, %v2540_v0  ;;  %v2566_v7 = vpop.eup %1449 }
  0xca   : > { %v825_v2 = vadd.f32 %v2531_v9, %v824_v23  ;;  %v669_v23 = vmul.f32 1.442695, %v481_v3  ;;  %v3774_v9 = vld [vmem:[#allocation26_spill] sm:$0xff]  ;;  %1453 = vpow2.f32 %v661_v19  ;;  %v551_v3 = vmul.f32 1.442695, %v422_v28 }
  0xcb   : > { %v424_v52 = vsub.f32 %v3774_v9, %v2540_v0  ;;  %1455 = vpow2.f32 %v665_v54  ;;  %v3780_v28 = vsub.f32 %v2116_v36, %v2333_v15 }
  0xcc   : > { %v826_v1 = vadd.f32 %v2536_v37, %v825_v2  ;;  %v426_v2 = vsub.f32 %v3775_v50, %v2540_v0  ;;  %v677_v37 = vmul.f32 1.442695, %v485_v25  ;;  %1457 = vpow2.f32 %v669_v23  ;;  %v3778_v50 = vld [vmem:[#allocation31_spill] sm:$0xff] }
  0xcd   : > { %v555_v21 = vmul.f32 1.442695, %v424_v52  ;;  %1459 = vpow2.f32 %v673_v47  ;;  %v432_v33 = vsub.f32 %v3778_v50, %v2540_v0  ;;  %v681_v23 = vmul.f32 1.442695, %v3780_v28 }
  0xce   : > { %v827_v29 = vadd.f32 %v2545_v5, %v826_v1  ;;  %v3777_v1 = vld [vmem:[#allocation29_spill] sm:$0xff]  ;;  %v2571_v5 = vpop.eup %1451  ;;  %v559_v25 = vmul.f32 1.442695, %v426_v2  ;;  %1461 = vpow2.f32 %v677_v37 }
  0xcf   : > { %v430_v19 = vsub.f32 %v3777_v1, %v2540_v0  ;;  %1463 = vpow2.f32 %v551_v3  ;;  %v3784_v3 = vld [vmem:[#allocation34_spill] sm:$0xff] }
  0xd0   : > { %v828_v38 = vadd.f32 %v2552_v13, %v827_v29  ;;  %v563_v13 = vmul.f32 1.442695, %v428_v43  ;;  %v2576_v54 = vpop.eup %1453  ;;  %1465 = vpow2.f32 %v555_v21  ;;  %v436_v50 = vsub.f32 %v3784_v3, %v2540_v0  ;;  %v3791_v3 = vld [vmem:[#allocation38_spill] sm:$0xff] }
  0xd1   : > { %3779 = vst [vmem:[#allocation24_spill] sm:$0xff] %v2576_v54  ;;  %v567_v37 = vmul.f32 1.442695, %v430_v19  ;;  %v2584_v2 = vpop.eup %1455  ;;  %1467 = vpow2.f32 %v559_v25  ;;  %v3785_v19 = vsub.f32 %v2132_v57, %v2333_v15  ;;  %v3787_v25 = vld [vmem:[#allocation37_spill] sm:$0xff] }
  0xd2   : > { %v829_v9 = vadd.f32 %v2559_v27, %v828_v38  ;;  %v3781_v38 = vld [vmem:[#allocation33_spill] sm:$0xff]  ;;  %3782 = vst [vmem:[#allocation30_spill] sm:$0xff] %v2584_v2  ;;  %v2589_v1 = vpop.eup %1457  ;;  %1469 = vpow2.f32 %v563_v13  ;;  %v3789_v13 = vsub.f32 %v2138_v8, %v2333_v15 }
  0xd3   : > { %v434_v47 = vsub.f32 %v3781_v38, %v2540_v0  ;;  %v2594_v28 = vpop.eup %1459  ;;  %1471 = vpow2.f32 %v681_v23  ;;  %v689_v21 = vmul.f32 1.442695, %v3785_v19  ;;  %v440_v19 = vsub.f32 %v3791_v3, %v2540_v0 }
  0xd4   : > { %v830_v29 = vadd.f32 %v2566_v7, %v829_v9  ;;  %v3783_v9 = vsub.f32 %v2122_v45, %v2333_v15  ;;  %v2599_v38 = vpop.eup %1461  ;;  %1473 = vpow2.f32 %v567_v37 }
  0xd5   : > { %3786 = vst [vmem:[#allocation32_spill] sm:$0xff] %v2599_v38 }
  0xd6   : > { %v831_v52 = vadd.f32 %v2571_v5, %v830_v29  ;;  %v685_v43 = vmul.f32 1.442695, %v3783_v9  ;;  %v571_v29 = vmul.f32 1.442695, %v432_v33  ;;  %v438_v9 = vsub.f32 %v3787_v25, %v2540_v0 }
  0xd7   : > { %v693_v33 = vmul.f32 1.442695, %v3789_v13 }
  0xd8   : > { %v832_v36 = vadd.f32 %v2576_v54, %v831_v52  ;;  %v575_v52 = vmul.f32 1.442695, %v434_v47  ;;  %v2604_v54 = vpop.eup %1463  ;;  %1475 = vpow2.f32 %v685_v43  ;;  %v3792_v47 = vsub.f32 %v2148_v24, %v2333_v15 }
  0xd9   : > { %3788 = vst [vmem:[#allocation35_spill] sm:$0xff] %v2604_v54  ;;  %v2609_v23 = vpop.eup %1465  ;;  %1477 = vpow2.f32 %v571_v29  ;;  %v583_v29 = vmul.f32 1.442695, %v438_v9  ;;  %v3798_v9 = vsub.f32 %v2164_v32, %v2333_v15 }
  0xda   : > { %v833_v45 = vadd.f32 %v2584_v2, %v832_v36  ;;  %3790 = vst [vmem:[#allocation36_spill] sm:$0xff] %v2609_v23  ;;  %v579_v36 = vmul.f32 1.442695, %v436_v50  ;;  %v2614_v2 = vpop.eup %1467  ;;  %1479 = vpow2.f32 %v689_v21  ;;  %v697_v37 = vmul.f32 1.442695, %v3792_v47 }
  0xdb   : > { %v874_v8 = vadd.f32 %v2609_v23, %v2604_v54  ;;  %v2621_v43 = vpop.eup %1469  ;;  %1481 = vpow2.f32 %v575_v52  ;;  %v3795_v21 = vsub.f32 %v2154_v40, %v2333_v15 }
  0xdc   : > { %v834_v57 = vadd.f32 %v2589_v1, %v833_v45  ;;  %v3793_v45 = vld [vmem:[#allocation41_spill] sm:$0xff]  ;;  %v2626_v50 = vpop.eup %1471  ;;  %1483 = vpow2.f32 %v693_v33  ;;  %v705_v33 = vmul.f32 1.442695, %v3798_v9 }
  0xdd   : > { %v442_v13 = vsub.f32 %v3793_v45, %v2540_v0  ;;  %3794 = vst [vmem:[#allocation39_spill] sm:$0xff] %v2626_v50  ;;  %v701_v24 = vmul.f32 1.442695, %v3795_v21  ;;  %v875_v3 = vadd.f32 %v2614_v2, %v874_v8  ;;  %v2632_v47 = vpop.eup %1473  ;;  %1485 = vpow2.f32 %v579_v36 }
  0xde   : > { %v835_v25 = vadd.f32 %v2594_v28, %v834_v57  ;;  %v3796_v57 = vld [vmem:[#allocation42_spill] sm:$0xff]  ;;  %v587_v45 = vmul.f32 1.442695, %v440_v19  ;;  %v2637_v52 = vpop.eup %1475  ;;  %1487 = vpow2.f32 %v697_v37  ;;  %v3801_v19 = vsub.f32 %v2170_v55, %v2333_v15 }
  0xdf   : > { %v444_v54 = vsub.f32 %v3796_v57, %v2540_v0  ;;  %3797 = vst [vmem:[#allocation40_spill] sm:$0xff] %v2637_v52  ;;  %v876_v40 = vadd.f32 %v2621_v43, %v875_v3  ;;  %v2643_v21 = vpop.eup %1477  ;;  %1489 = vpow2.f32 %v583_v29  ;;  %v591_v57 = vmul.f32 1.442695, %v442_v13 }
  0xe0   : > { %v836_v23 = vadd.f32 %v2599_v38, %v835_v25  ;;  %v3799_v25 = vld [vmem:[#allocation43_spill] sm:$0xff]  ;;  %v2648_v36 = vpop.eup %1479  ;;  %1491 = vpow2.f32 %v701_v24  ;;  %v709_v37 = vmul.f32 1.442695, %v3801_v19  ;;  %v3804_v13 = vsub.f32 %v2180_v16, %v2333_v15 }
  0xe1   : > { %v446_v38 = vsub.f32 %v3799_v25, %v2540_v0  ;;  %3800 = vst [vmem:[#allocation25_spill] sm:$0xff] %v2648_v36  ;;  %v877_v32 = vadd.f32 %v2632_v47, %v876_v40  ;;  %v2654_v9 = vpop.eup %1481  ;;  %1493 = vpow2.f32 %v587_v45  ;;  %v595_v25 = vmul.f32 1.442695, %v444_v54 }
  0xe2   : > { %v837_v8 = vadd.f32 %v2626_v50, %v836_v23  ;;  %v3802_v23 = vld [vmem:[#allocation44_spill] sm:$0xff]  ;;  %v2659_v29 = vpop.eup %1483  ;;  %1495 = vpow2.f32 %v705_v33  ;;  %v713_v24 = vmul.f32 1.442695, %v3804_v13  ;;  %v3807_v54 = vsub.f32 %v2186_v22, %v2333_v15 }
  0xe3   : > { %v448_v50 = vsub.f32 %v3802_v23, %v2540_v0  ;;  %3803 = vst [vmem:[#allocation26_spill] sm:$0xff] %v2659_v29  ;;  %v878_v55 = vadd.f32 %v2643_v21, %v877_v32  ;;  %v2665_v19 = vpop.eup %1485  ;;  %1497 = vpow2.f32 %v591_v57  ;;  %v599_v23 = vmul.f32 1.442695, %v446_v38 }
  0xe4   : > { %v838_v3 = vadd.f32 %v2637_v52, %v837_v8  ;;  %v3805_v8 = vld [vmem:[#allocation45_spill] sm:$0xff]  ;;  %v2670_v45 = vpop.eup %1487  ;;  %1499 = vpow2.f32 %v709_v37  ;;  %v717_v33 = vmul.f32 1.442695, %v3807_v54  ;;  %v3810_v38 = vsub.f32 %v2196_v61, %v2333_v15 }
  0xe5   : > { %v450_v52 = vsub.f32 %v3805_v8, %v2540_v0  ;;  %3806 = vst [vmem:[#allocation27_spill] sm:$0xff] %v2670_v45  ;;  %v879_v16 = vadd.f32 %v2654_v9, %v878_v55  ;;  %v2676_v13 = vpop.eup %1489  ;;  %1501 = vpow2.f32 %v595_v25  ;;  %v603_v8 = vmul.f32 1.442695, %v448_v50 }
  0xe6   : > { %v839_v40 = vadd.f32 %v2648_v36, %v838_v3  ;;  %v3808_v3 = vld [vmem:[#allocation46_spill] sm:$0xff]  ;;  %v2681_v57 = vpop.eup %1491  ;;  %1503 = vpow2.f32 %v713_v24  ;;  %v721_v37 = vmul.f32 1.442695, %v3810_v38  ;;  %v3813_v50 = vsub.f32 %v2202_v34, %v2333_v15 }
  0xe7   : > { %v452_v36 = vsub.f32 %v3808_v3, %v2540_v0  ;;  %3809 = vst [vmem:[#allocation28_spill] sm:$0xff] %v2681_v57  ;;  %v880_v22 = vadd.f32 %v2665_v19, %v879_v16  ;;  %v2687_v54 = vpop.eup %1493  ;;  %1505 = vpow2.f32 %v599_v23  ;;  %v607_v3 = vmul.f32 1.442695, %v450_v52 }
  0xe8   : > { %v840_v32 = vadd.f32 %v2659_v29, %v839_v40  ;;  %v3811_v40 = vld [vmem:[#allocation47_spill] sm:$0xff]  ;;  %v2692_v25 = vpop.eup %1495  ;;  %1507 = vpow2.f32 %v717_v33  ;;  %v725_v24 = vmul.f32 1.442695, %v3813_v50  ;;  %v3816_v52 = vsub.f32 %v2212_v53, %v2333_v15 }
  0xe9   : > { %v454_v29 = vsub.f32 %v3811_v40, %v2540_v0  ;;  %3812 = vst [vmem:[#allocation29_spill] sm:$0xff] %v2692_v25  ;;  %v881_v61 = vadd.f32 %v2676_v13, %v880_v22  ;;  %v2698_v38 = vpop.eup %1497  ;;  %1509 = vpow2.f32 %v603_v8  ;;  %v611_v40 = vmul.f32 1.442695, %v452_v36 }
  0xea   : > { %v841_v55 = vadd.f32 %v2670_v45, %v840_v32  ;;  %v3814_v32 = vld [vmem:[#allocation48_spill] sm:$0xff]  ;;  %v2703_v23 = vpop.eup %1499  ;;  %1511 = vpow2.f32 %v721_v37  ;;  %v729_v33 = vmul.f32 1.442695, %v3816_v52  ;;  %v3819_v36 = vsub.f32 %v2218_v18, %v2333_v15 }
  0xeb   : > { %v456_v45 = vsub.f32 %v3814_v32, %v2540_v0  ;;  %3815 = vst [vmem:[#allocation31_spill] sm:$0xff] %v2703_v23  ;;  %v882_v34 = vadd.f32 %v2687_v54, %v881_v61  ;;  %v2709_v50 = vpop.eup %1501  ;;  %1513 = vpow2.f32 %v607_v3  ;;  %v615_v32 = vmul.f32 1.442695, %v454_v29 }
  0xec   : > { %v842_v16 = vadd.f32 %v2681_v57, %v841_v55  ;;  %v3817_v55 = vld [vmem:[#allocation49_spill] sm:$0xff]  ;;  %v2714_v8 = vpop.eup %1503  ;;  %1515 = vpow2.f32 %v725_v24  ;;  %v733_v37 = vmul.f32 1.442695, %v3819_v36  ;;  %v3822_v29 = vsub.f32 %v2228_v51, %v2333_v15 }
  0xed   : > { %v458_v57 = vsub.f32 %v3817_v55, %v2540_v0  ;;  %3818 = vst [vmem:[#allocation33_spill] sm:$0xff] %v2714_v8  ;;  %v883_v53 = vadd.f32 %v2698_v38, %v882_v34  ;;  %v2720_v52 = vpop.eup %1505  ;;  %1517 = vpow2.f32 %v611_v40  ;;  %v619_v55 = vmul.f32 1.442695, %v456_v45 }
  0xee   : > { %v843_v22 = vadd.f32 %v2692_v25, %v842_v16  ;;  %v3820_v16 = vld [vmem:[#allocation50_spill] sm:$0xff]  ;;  %v2725_v3 = vpop.eup %1507  ;;  %1519 = vpow2.f32 %v729_v33  ;;  %v737_v24 = vmul.f32 1.442695, %v3822_v29  ;;  %v3825_v45 = vsub.f32 %v2234_v62, %v2333_v15 }
  0xef   : > { %v460_v25 = vsub.f32 %v3820_v16, %v2540_v0  ;;  %3821 = vst [vmem:[#allocation34_spill] sm:$0xff] %v2725_v3  ;;  %v884_v18 = vadd.f32 %v2709_v50, %v883_v53  ;;  %v2731_v36 = vpop.eup %1509  ;;  %1521 = vpow2.f32 %v615_v32  ;;  %v623_v16 = vmul.f32 1.442695, %v458_v57 }
  0xf0   : > { %v844_v61 = vadd.f32 %v2703_v23, %v843_v22  ;;  %v3823_v22 = vld [vmem:[#allocation51_spill] sm:$0xff]  ;;  %v2736_v40 = vpop.eup %1511  ;;  %1523 = vpow2.f32 %v733_v37  ;;  %v741_v33 = vmul.f32 1.442695, %v3825_v45  ;;  %v3828_v57 = vsub.f32 %v2244_v48, %v2333_v15 }
  0xf1   : > { %v462_v23 = vsub.f32 %v3823_v22, %v2540_v0  ;;  %3824 = vst [vmem:[#allocation37_spill] sm:$0xff] %v2736_v40  ;;  %v885_v51 = vadd.f32 %v2720_v52, %v884_v18  ;;  %v2742_v29 = vpop.eup %1513  ;;  %1525 = vpow2.f32 %v619_v55  ;;  %v627_v22 = vmul.f32 1.442695, %v460_v25 }
  0xf2   : > { %v845_v34 = vadd.f32 %v2714_v8, %v844_v61  ;;  %v3826_v61 = vld [vmem:[#allocation52_spill] sm:$0xff]  ;;  %v2747_v32 = vpop.eup %1515  ;;  %1527 = vpow2.f32 %v737_v24  ;;  %v745_v37 = vmul.f32 1.442695, %v3828_v57  ;;  %v3831_v25 = vsub.f32 %v2250_v56, %v2333_v15 }
  0xf3   : > { %v464_v8 = vsub.f32 %v3826_v61, %v2540_v0  ;;  %3827 = vst [vmem:[#allocation38_spill] sm:$0xff] %v2747_v32  ;;  %v886_v62 = vadd.f32 %v2731_v36, %v885_v51  ;;  %v2753_v45 = vpop.eup %1517  ;;  %1529 = vpow2.f32 %v623_v16  ;;  %v631_v61 = vmul.f32 1.442695, %v462_v23 }
  0xf4   : > { %v846_v53 = vadd.f32 %v2725_v3, %v845_v34  ;;  %v3829_v34 = vld [vmem:[#allocation53_spill] sm:$0xff]  ;;  %v2758_v55 = vpop.eup %1519  ;;  %1531 = vpow2.f32 %v741_v33  ;;  %v749_v24 = vmul.f32 1.442695, %v3831_v25  ;;  %v3834_v23 = vsub.f32 %v2258_v20, %v2333_v15 }
  0xf5   : > { %v466_v3 = vsub.f32 %v3829_v34, %v2540_v0  ;;  %3830 = vst [vmem:[#allocation41_spill] sm:$0xff] %v2758_v55  ;;  %v887_v48 = vadd.f32 %v2742_v29, %v886_v62  ;;  %v2764_v57 = vpop.eup %1521  ;;  %1533 = vpow2.f32 %v627_v22  ;;  %v635_v34 = vmul.f32 1.442695, %v464_v8 }
  0xf6   : > { %v847_v18 = vadd.f32 %v2736_v40, %v846_v53  ;;  %v3832_v53 = vld [vmem:[#allocation54_spill] sm:$0xff]  ;;  %v2769_v16 = vpop.eup %1523  ;;  %1535 = vpow2.f32 %v745_v37  ;;  %v753_v33 = vmul.f32 1.442695, %v3834_v23  ;;  %v3837_v8 = vsub.f32 %v2264_v6, %v2333_v15 }
  0xf7   : > { %v468_v40 = vsub.f32 %v3832_v53, %v2540_v0  ;;  %3833 = vst [vmem:[#allocation42_spill] sm:$0xff] %v2769_v16  ;;  %v888_v56 = vadd.f32 %v2753_v45, %v887_v48  ;;  %v2775_v25 = vpop.eup %1525  ;;  %1537 = vpow2.f32 %v631_v61  ;;  %v639_v53 = vmul.f32 1.442695, %v466_v3 }
  0xf8   : > { %v848_v51 = vadd.f32 %v2747_v32, %v847_v18  ;;  %v3835_v18 = vld [vmem:[#allocation55_spill] sm:$0xff]  ;;  %v2780_v22 = vpop.eup %1527  ;;  %1539 = vpow2.f32 %v749_v24  ;;  %v757_v37 = vmul.f32 1.442695, %v3837_v8  ;;  %v3840_v3 = vsub.f32 %v2270_v63, %v2333_v15 }
  0xf9   : > { %v470_v32 = vsub.f32 %v3835_v18, %v2540_v0  ;;  %3836 = vst [vmem:[#allocation43_spill] sm:$0xff] %v2780_v22  ;;  %v889_v20 = vadd.f32 %v2764_v57, %v888_v56  ;;  %v2786_v23 = vpop.eup %1529  ;;  %1541 = vpow2.f32 %v635_v34  ;;  %v643_v18 = vmul.f32 1.442695, %v468_v40 }
  0xfa   : > { %v849_v62 = vadd.f32 %v2758_v55, %v848_v51  ;;  %v3838_v51 = vld [vmem:[#allocation56_spill] sm:$0xff]  ;;  %v2791_v61 = vpop.eup %1531  ;;  %1543 = vpow2.f32 %v753_v33  ;;  %v761_v24 = vmul.f32 1.442695, %v3840_v3  ;;  %v3843_v40 = vsub.f32 %v2275_v46, %v2333_v15 }
  0xfb   : > { %v472_v55 = vsub.f32 %v3838_v51, %v2540_v0  ;;  %3839 = vst [vmem:[#allocation44_spill] sm:$0xff] %v2791_v61  ;;  %v890_v6 = vadd.f32 %v2775_v25, %v889_v20  ;;  %v2797_v8 = vpop.eup %1533  ;;  %1545 = vpow2.f32 %v639_v53  ;;  %v647_v51 = vmul.f32 1.442695, %v470_v32 }
  0xfc   : > { %v850_v48 = vadd.f32 %v2769_v16, %v849_v62  ;;  %v3841_v62 = vld [vmem:[#allocation57_spill] sm:$0xff]  ;;  %v2802_v34 = vpop.eup %1535  ;;  %1547 = vpow2.f32 %v757_v37  ;;  %v765_v33 = vmul.f32 1.442695, %v3843_v40  ;;  %v3846_v53 = vsub.f32 %v2281_v49, %v2333_v15 }
  0xfd   : > { %v474_v16 = vsub.f32 %v3841_v62, %v2540_v0  ;;  %3842 = vst [vmem:[#allocation45_spill] sm:$0xff] %v2802_v34  ;;  %v891_v63 = vadd.f32 %v2786_v23, %v890_v6  ;;  %v2808_v3 = vpop.eup %1537  ;;  %1549 = vpow2.f32 %v643_v18  ;;  %v651_v62 = vmul.f32 1.442695, %v472_v55 }
  0xfe   : > { %v851_v56 = vadd.f32 %v2780_v22, %v850_v48  ;;  %v3844_v48 = vld [vmem:[#allocation58_spill] sm:$0xff]  ;;  %v2813_v32 = vpop.eup %1539  ;;  %1551 = vpow2.f32 %v761_v24  ;;  %v769_v46 = vmul.f32 1.442695, %v3846_v53  ;;  %v3849_v24 = vsub.f32 %v2285_v58, %v2333_v15 }
  0xff   : > { %v476_v22 = vsub.f32 %v3844_v48, %v2540_v0  ;;  %3845 = vst [vmem:[#allocation46_spill] sm:$0xff] %v2813_v32  ;;  %v892_v37 = vadd.f32 %v2797_v8, %v891_v63  ;;  %v2819_v6 = vpop.eup %1541  ;;  %1553 = vpow2.f32 %v647_v51  ;;  %v655_v18 = vmul.f32 1.442695, %v474_v16 }
 0x100   : > { %v852_v20 = vadd.f32 %v2791_v61, %v851_v56  ;;  %v3847_v56 = vld [vmem:[#allocation59_spill] sm:$0xff]  ;;  %v2824_v55 = vpop.eup %1543  ;;  %1555 = vpow2.f32 %v765_v33  ;;  %v773_v49 = vmul.f32 1.442695, %v3849_v24  ;;  %v3851_v33 = vsub.f32 %v2289_v60, %v2333_v15 }
 0x101   : > { %v478_v61 = vsub.f32 %v3847_v56, %v2540_v0  ;;  %3848 = vst [vmem:[#allocation47_spill] sm:$0xff] %v2824_v55  ;;  %v893_v48 = vadd.f32 %v2808_v3, %v892_v37  ;;  %v2830_v63 = vpop.eup %1545  ;;  %1557 = vpow2.f32 %v651_v62  ;;  %v659_v51 = vmul.f32 1.442695, %v476_v22 }
 0x102   : > { %v853_v40 = vadd.f32 %v2802_v34, %v852_v20  ;;  %v1657_v20 = vld [vmem:[%s1936_s22 + $0x1d8] sm:$0xff]  ;;  %v2835_v16 = vpop.eup %1547  ;;  %1559 = vpow2.f32 %v769_v46  ;;  %v777_v58 = vmul.f32 1.442695, %v3851_v33  ;;  %v3853_v46 = vsub.f32 %v2293_v41, %v2333_v15 }
 0x103   : > { %v480_v34 = vsub.f32 %v1657_v20, %v2540_v0  ;;  %3850 = vst [vmem:[#allocation48_spill] sm:$0xff] %v2835_v16  ;;  %v894_v56 = vadd.f32 %v2819_v6, %v893_v48  ;;  %v2841_v37 = vpop.eup %1549  ;;  %1561 = vpow2.f32 %v655_v18  ;;  %v663_v62 = vmul.f32 1.442695, %v478_v61 }
 0x104   : > { %v854_v53 = vadd.f32 %v2813_v32, %v853_v40  ;;  %v1658_v40 = vld [vmem:[%s1936_s22 + $0x1e8] sm:$0xff]  ;;  %v2846_v22 = vpop.eup %1551  ;;  %1563 = vpow2.f32 %v773_v49  ;;  %v781_v60 = vmul.f32 1.442695, %v3853_v46  ;;  %v3855_v49 = vsub.f32 %v2299_v10, %v2333_v15 }
 0x105   : > { %v482_v32 = vsub.f32 %v1658_v40, %v2540_v0  ;;  %3852 = vst [vmem:[#allocation49_spill] sm:$0xff] %v2846_v22  ;;  %v895_v20 = vadd.f32 %v2830_v63, %v894_v56  ;;  %v2852_v48 = vpop.eup %1553  ;;  %1565 = vpow2.f32 %v659_v51  ;;  %v667_v18 = vmul.f32 1.442695, %v480_v34 }
 0x106   : > { %v855_v24 = vadd.f32 %v2824_v55, %v854_v53  ;;  %v1659_v53 = vld [vmem:[%s1936_s22 + $0x1f8] sm:$0xff]  ;;  %v2857_v61 = vpop.eup %1555  ;;  %1567 = vpow2.f32 %v777_v58  ;;  %v785_v41 = vmul.f32 1.442695, %v3855_v49  ;;  %v3857_v58 = vsub.f32 %v2303_v30, %v2333_v15 }
 0x107   : > { %v484_v55 = vsub.f32 %v1659_v53, %v2540_v0  ;;  %3854 = vst [vmem:[#allocation50_spill] sm:$0xff] %v2857_v61  ;;  %v896_v40 = vadd.f32 %v2841_v37, %v895_v20  ;;  %v2863_v56 = vpop.eup %1557  ;;  %1569 = vpow2.f32 %v663_v62  ;;  %v671_v51 = vmul.f32 1.442695, %v482_v32 }
 0x108   : > { %v856_v33 = vadd.f32 %v2835_v16, %v855_v24  ;;  %v1660_v24 = vld [vmem:[%s1936_s22 + $0x208] sm:$0xff]  ;;  %v2868_v34 = vpop.eup %1559  ;;  %1571 = vpow2.f32 %v781_v60  ;;  %v789_v10 = vmul.f32 1.442695, %v3857_v58  ;;  %v3859_v60 = vsub.f32 %v2307_v44, %v2333_v15 }
 0x109   : > { %v486_v16 = vsub.f32 %v1660_v24, %v2540_v0  ;;  %3856 = vst [vmem:[#allocation51_spill] sm:$0xff] %v2868_v34  ;;  %v897_v53 = vadd.f32 %v2852_v48, %v896_v40  ;;  %v2874_v20 = vpop.eup %1561  ;;  %1573 = vpow2.f32 %v667_v18  ;;  %v675_v62 = vmul.f32 1.442695, %v484_v55 }
 0x10a   : > { %v857_v46 = vadd.f32 %v2846_v22, %v856_v33  ;;  %v1661_v33 = vld [vmem:[%s1936_s22 + $0x218] sm:$0xff]  ;;  %v2879_v32 = vpop.eup %1563  ;;  %1575 = vpow2.f32 %v785_v41  ;;  %v793_v24 = vmul.f32 1.442695, %v3859_v60  ;;  %v3861_v41 = vsub.f32 %v2311_v12, %v2333_v15 }
 0x10b   : > { %v488_v22 = vsub.f32 %v1661_v33, %v2540_v0  ;;  %3858 = vst [vmem:[#allocation52_spill] sm:$0xff] %v2879_v32  ;;  %v898_v30 = vadd.f32 %v2863_v56, %v897_v53  ;;  %v2885_v58 = vpop.eup %1565  ;;  %1577 = vpow2.f32 %v671_v51  ;;  %v679_v18 = vmul.f32 1.442695, %v486_v16 }
 0x10c   : > { %v858_v49 = vadd.f32 %v2857_v61, %v857_v46  ;;  %v1662_v46 = vld [vmem:[%s1936_s22 + $0x228] sm:$0xff]  ;;  %v2890_v55 = vpop.eup %1567  ;;  %1579 = vpow2.f32 %v789_v10  ;;  %v797_v44 = vmul.f32 1.442695, %v3861_v41  ;;  %v3864_v16 = vsub.f32 %v2317_v35, %v2333_v15  ;;  %v1663_v10 = vld [vmem:[%s1936_s22 + $0x238] sm:$0xff] }
 0x10d   : > { %v490_v61 = vsub.f32 %v1662_v46, %v2540_v0  ;;  %3860 = vst [vmem:[#allocation53_spill] sm:$0xff] %v2890_v55  ;;  %v899_v33 = vadd.f32 %v2874_v20, %v898_v30  ;;  %v2896_v53 = vpop.eup %1569  ;;  %1581 = vpow2.f32 %v675_v62  ;;  %v683_v60 = vmul.f32 1.442695, %v488_v22 }
 0x10e   : > { %v859_v40 = vadd.f32 %v2868_v34, %v858_v49  ;;  %3862 = vst [vmem:[#allocation54_spill] sm:$0xff] %v2896_v53  ;;  %v2899_v34 = vpop.eup %1571  ;;  %1583 = vpow2.f32 %v793_v24  ;;  %v801_v51 = vmul.f32 1.442695, %v3864_v16  ;;  %v492_v12 = vsub.f32 %v1663_v10, %v2540_v0  ;;  %v1664_v24 = vld [vmem:[%s1936_s22 + $0x248] sm:$0xff] }
 0x10f   : > { %3863 = vst [vmem:[#allocation55_spill] sm:$0xff] %v2899_v34  ;;  %v900_v30 = vadd.f32 %v2885_v58, %v899_v33  ;;  %v2907_v46 = vpop.eup %1573  ;;  %1585 = vpow2.f32 %v679_v18  ;;  %v687_v62 = vmul.f32 1.442695, %v490_v61  ;;  %v494_v15 = vsub.f32 %v1664_v24, %v2540_v0  ;;  %v1665_v18 = vld [vmem:[%s1936_s22 + $0x258] sm:$0xff] }
 0x110   : > { %v860_v49 = vadd.f32 %v2879_v32, %v859_v40  ;;  %3865 = vst [vmem:[#allocation56_spill] sm:$0xff] %v2907_v46  ;;  %v2910_v22 = vpop.eup %1575  ;;  %1587 = vpow2.f32 %v797_v44  ;;  %v496_v61 = vsub.f32 %v1665_v18, %v2540_v0 }
 0x111   : > { %3866 = vst [vmem:[#allocation57_spill] sm:$0xff] %v2910_v22  ;;  %v901_v35 = vadd.f32 %v2896_v53, %v900_v30  ;;  %v2915_v40 = vpop.eup %1577  ;;  %1589 = vpow2.f32 %v683_v60 }
 0x112   : > { %v861_v41 = vadd.f32 %v2890_v55, %v860_v49  ;;  %3867 = vst [vmem:[#allocation58_spill] sm:$0xff] %v2915_v40  ;;  %v2918_v33 = vpop.eup %1579  ;;  %1591 = vpow2.f32 %v801_v51  ;;  %v691_v49 = vmul.f32 1.442695, %v492_v12  ;;  %v1666_v55 = vld [vmem:[%s1936_s22 + $0x268] sm:$0xff] }
 0x113   : > { %3868 = vst [vmem:[#allocation59_spill] sm:$0xff] %v2918_v33  ;;  %v902_v44 = vadd.f32 %v2907_v46, %v901_v35  ;;  %v2923_v10 = vpop.eup %1581  ;;  %1593 = vpow2.f32 %v687_v62  ;;  %v498_v60 = vsub.f32 %v1666_v55, %v2540_v0  ;;  %v1667_v35 = vld [vmem:[%s1936_s22 + $0x278] sm:$0xff]  ;;  %v699_v62 = vmul.f32 1.442695, %v496_v61 }
 0x114   : > { %v862_v16 = vadd.f32 %v2899_v34, %v861_v41  ;;  %3869 = vst [vmem:[#allocation60_spill] sm:$0xff] %v2923_v10  ;;  %v2926_v30 = vpop.eup %1583  ;;  %v695_v41 = vmul.f32 1.442695, %v494_v15  ;;  %v500_v32 = vsub.f32 %v1667_v35, %v2540_v0  ;;  %1595 = vpow2.f32 %v691_v49  ;;  %v1668_v49 = vld [vmem:[%s1936_s22 + $0x288] sm:$0xff] }
 0x115   : > { %3870 = vst [vmem:[#allocation61_spill] sm:$0xff] %v2926_v30  ;;  %v903_v51 = vadd.f32 %v2915_v40, %v902_v44  ;;  %v2931_v34 = vpop.eup %1585  ;;  %v703_v44 = vmul.f32 1.442695, %v498_v60  ;;  %v502_v61 = vsub.f32 %v1668_v49, %v2540_v0 }
 0x116   : > { %v863_v24 = vadd.f32 %v2910_v22, %v862_v16  ;;  %3871 = vst [vmem:[#allocation62_spill] sm:$0xff] %v2931_v34  ;;  %v2934_v18 = vpop.eup %1587  ;;  %1597 = vpow2.f32 %v695_v41 }
 0x117   : > { %3872 = vst [vmem:[#allocation63_spill] sm:$0xff] %v2934_v18  ;;  %v904_v16 = vadd.f32 %v2923_v10, %v903_v51  ;;  %v2939_v22 = vpop.eup %1589  ;;  %1599 = vpow2.f32 %v699_v62  ;;  %v707_v51 = vmul.f32 1.442695, %v500_v32  ;;  %v711_v62 = vmul.f32 1.442695, %v502_v61 }
 0x118   : > { %v864_v12 = vadd.f32 %v2918_v33, %v863_v24  ;;  %3873 = vst [vmem:[#allocation64_spill] sm:$0xff] %v2939_v22  ;;  %v2942_v15 = vpop.eup %1591  ;;  %1601 = vpow2.f32 %v703_v44  ;;  %v1672_v44 = vld [vmem:[%s1936_s22 + $0x2c8] sm:$0xff] }
 0x119   : > { %3874 = vst [vmem:[#allocation65_spill] sm:$0xff] %v2942_v15  ;;  %v905_v24 = vadd.f32 %v2931_v34, %v904_v16  ;;  %v2945_v33 = vpop.eup %1593  ;;  %1603 = vpow2.f32 %v707_v51 }
 0x11a   : > { %v865_v55 = vadd.f32 %v2926_v30, %v864_v12  ;;  %3875 = vst [vmem:[#allocation66_spill] sm:$0xff] %v2945_v33  ;;  %v1669_v30 = vld [vmem:[%s1936_s22 + $0x298] sm:$0xff]  ;;  %v2954_v41 = vpop.eup %1595  ;;  %1605 = vpow2.f32 %v711_v62  ;;  %v1674_v62 = vld [vmem:[%s1936_s22 + $0x2e8] sm:$0xff] }
 0x11b   : > { %v906_v10 = vadd.f32 %v2939_v22, %v905_v24  ;;  %v504_v60 = vsub.f32 %v1669_v30, %v2540_v0  ;;  %3876 = vst [vmem:[#allocation67_spill] sm:$0xff] %v2954_v41 }
 0x11c   : > { %v866_v35 = vadd.f32 %v2934_v18, %v865_v55  ;;  %v1670_v18 = vld [vmem:[%s1936_s22 + $0x2a8] sm:$0xff]  ;;  %v2959_v32 = vpop.eup %1597 }
 0x11d   : > { %v907_v16 = vadd.f32 %v2945_v33, %v906_v10  ;;  %v506_v49 = vsub.f32 %v1670_v18, %v2540_v0  ;;  %3877 = vst [vmem:[#allocation68_spill] sm:$0xff] %v2959_v32  ;;  %v715_v30 = vmul.f32 1.442695, %v504_v60  ;;  %v2964_v34 = vpop.eup %1599  ;;  %v510_v10 = vsub.f32 %v1672_v44, %v2540_v0 }
 0x11e   : > { %v867_v12 = vadd.f32 %v2942_v15, %v866_v35  ;;  %v1671_v35 = vld [vmem:[%s1936_s22 + $0x2b8] sm:$0xff]  ;;  %3878 = vst [vmem:[#allocation69_spill] sm:$0xff] %v2964_v34  ;;  %v2969_v51 = vpop.eup %1601 }
 0x11f   : > { %v508_v15 = vsub.f32 %v1671_v35, %v2540_v0  ;;  %v908_v22 = vadd.f32 %v2954_v41, %v907_v16  ;;  %v719_v18 = vmul.f32 1.442695, %v506_v49  ;;  %3879 = vst [vmem:[#allocation70_spill] sm:$0xff] %v2969_v51  ;;  %1607 = vpow2.f32 %v715_v30  ;;  %v2974_v41 = vpop.eup %1603 }
 0x120   : > { %v868_v55 = vrot.slane %v867_v12, 4  ;;  %3880 = vst [vmem:[#allocation71_spill] sm:$0xff] %v2974_v41  ;;  %v727_v40 = vmul.f32 1.442695, %v510_v10  ;;  %v514_v49 = vsub.f32 %v1674_v62, %v2540_v0 }
 0x121   : > { %v909_v61 = vadd.f32 %v2959_v32, %v908_v22  ;;  %v723_v16 = vmul.f32 1.442695, %v508_v15  ;;  %1609 = vpow2.f32 %v719_v18  ;;  %v1675_v32 = vld [vmem:[%s1936_s22 + $0x2f8] sm:$0xff] }
 0x122   : > { %v869_v24 = vadd.f32 %v868_v55, %v867_v12  ;;  %v1673_v12 = vld [vmem:[%s1936_s22 + $0x2d8] sm:$0xff] }
 0x123   : > { %v512_v55 = vsub.f32 %v1673_v12, %v2540_v0  ;;  %v910_v35 = vadd.f32 %v2964_v34, %v909_v61  ;;  %v516_v12 = vsub.f32 %v1675_v32, %v2540_v0  ;;  %1611 = vpow2.f32 %v723_v16  ;;  %v1676_v61 = vld [vmem:[%s1936_s22 + $0x308] sm:$0xff] }
 0x124   : > { %v870_v33 = vrot.slane %v869_v24, 2  ;;  %1613 = vpow2.f32 %v727_v40  ;;  %v518_v18 = vsub.f32 %v1676_v61, %v2540_v0 }
 0x125   : > { %v911_v22 = vadd.f32 %v2969_v51, %v910_v35  ;;  %v735_v35 = vmul.f32 1.442695, %v514_v49  ;;  %v1677_v51 = vld [vmem:[%s1936_s22 + $0x318] sm:$0xff] }
 0x126   : > { %v871_v60 = vadd.f32 %v870_v33, %v869_v24  ;;  %v2981_v33 = vpop.eup %1605  ;;  %v731_v24 = vmul.f32 1.442695, %v512_v55  ;;  %v739_v55 = vmul.f32 1.442695, %v516_v12  ;;  %v743_v49 = vmul.f32 1.442695, %v518_v18 }
 0x127   : > { %3881 = vst [vmem:[#allocation72_spill] sm:$0xff] %v2981_v33  ;;  %v912_v30 = vadd.f32 %v2974_v41, %v911_v22  ;;  %v2984_v10 = vpop.eup %1607  ;;  %v1679_v41 = vld [vmem:[%s1936_s22 + $0x338] sm:$0xff] }
 0x128   : > { %v872_v44 = vrot.slane %v871_v60, 1  ;;  %3882 = vst [vmem:[#allocation73_spill] sm:$0xff] %v2984_v10  ;;  %v2989_v32 = vpop.eup %1609 }
 0x129   : > { %v913_v62 = vadd.f32 %v2981_v33, %v912_v30  ;;  %3883 = vst [vmem:[#allocation74_spill] sm:$0xff] %v2989_v32  ;;  %v2994_v16 = vpop.eup %1611 }
 0x12a   : > { %v873_v15 = vadd.f32 %v872_v44, %v871_v60  ;;  %v520_v60 = vsub.f32 %v1677_v51, %v2540_v0  ;;  %3884 = vst [vmem:[#allocation75_spill] sm:$0xff] %v2994_v16  ;;  %v1678_v44 = vld [vmem:[%s1936_s22 + $0x328] sm:$0xff]  ;;  %v2998_v61 = vpop.eup %1613  ;;  %v524_v51 = vsub.f32 %v1679_v41, %v2540_v0 }
 0x12b   : > { %v914_v40 = vadd.f32 %v2984_v10, %v913_v62  ;;  %v522_v22 = vsub.f32 %v1678_v44, %v2540_v0  ;;  %3885 = vst [vmem:[#allocation76_spill] sm:$0xff] %v2998_v61  ;;  %v1680_v62 = vld [vmem:[%s1936_s22 + $0x348] sm:$0xff] }
 0x12c   : > { %1615 = vrcp.f32 %v873_v15  ;;  %v747_v12 = vmul.f32 1.442695, %v520_v60  ;;  %v526_v10 = vsub.f32 %v1680_v62, %v2540_v0  ;;  %vm948_vm0 = vweird.f32 %v873_v15  ;;  %v1681_v60 = vld [vmem:[%s1936_s22 + $0x358] sm:$0xff] }
 0x12d   : > { %1617 = vpow2.f32 %v731_v24  ;;  %v915_v30 = vadd.f32 %v2989_v32, %v914_v40  ;;  %v954_v18 = vand.u32 2147483648, %v873_v15  ;;  %v952_v32 = vand.u32 2147483647, %v873_v15 }
 0x12e   : > { %1619 = vpow2.f32 %v735_v35  ;;  %v751_v35 = vmul.f32 1.442695, %v522_v22  ;;  %v528_v46 = vsub.f32 %v1681_v60, %v2540_v0  ;;  %v759_v60 = vmul.f32 1.442695, %v526_v10 }
 0x12f   : > { %1621 = vpow2.f32 %v739_v55  ;;  %v916_v34 = vadd.f32 %v2994_v16, %v915_v30  ;;  %v755_v30 = vmul.f32 1.442695, %v524_v51  ;;  %vm953_vm3 = vcmp.eq.f32.partialorder %v952_v32, 8.507059e+37  ;;  %v1684_v32 = vld [vmem:[%s1936_s22 + $0x388] sm:$0xff] }
 0x130   : > { %1623 = vpow2.f32 %v743_v49  ;;  %v955_v49 = vor.u32 1.1754944e-38, %v954_v18 }
 0x131   : > { %v917_v41 = vadd.f32 %v2998_v61, %v916_v34  ;;  %1625 = vpow2.f32 %v747_v12  ;;  %v1682_v34 = vld [vmem:[%s1936_s22 + $0x368] sm:$0xff] }
 0x132   : > { %v1616_v33 = vpop.eup %1615  ;;  %1627 = vpow2.f32 %v751_v35 }
 0x133   : > { %v944_v24 = vmul.f32 %v1616_v33, %v873_v15  ;;  %v3006_v44 = vpop.eup %1617  ;;  %vm949_vm1 = vweird.f32 %v1616_v33  ;;  %1629 = vpow2.f32 %v755_v30 }
 0x134   : > { %v3009_v55 = vpop.eup %1619  ;;  %v918_v16 = vadd.f32 %v3006_v44, %v917_v41  ;;  %vm3017_vm2 = vmor %vm948_vm0, %vm949_vm1  ;;  %v763_v41 = vmul.f32 1.442695, %v528_v46  ;;  %1631 = vpow2.f32 %v759_v60 }
 0x135   : > { %v945_v40 = vsub.f32 1.0, %v944_v24  ;;  %v3014_v53 = vpop.eup %1621  ;;  %v530_v24 = vsub.f32 %v1682_v34, %v2540_v0 }
 0x136   : > { %v919_v51 = vadd.f32 %v3009_v55, %v918_v16  ;;  %v3024_v12 = vpop.eup %1623  ;;  %v534_v16 = vsub.f32 %v1684_v32, %v2540_v0  ;;  %1633 = vpow2.f32 %v763_v41 }
 0x137   : > { %v946_v62 = vmul.f32 %v1616_v33, %v945_v40  ;;  %v1683_v40 = vld [vmem:[%s1936_s22 + $0x378] sm:$0xff]  ;;  %v3031_v35 = vpop.eup %1625 }
 0x138   : > { %v532_v15 = vsub.f32 %v1683_v40, %v2540_v0  ;;  %v920_v34 = vadd.f32 %v3014_v53, %v919_v51  ;;  %3888 = vst [vmem:[#allocation77_spill] sm:$0xff] %v3031_v35  ;;  %v3040_v22 = vpop.eup %1627  ;;  %v775_v40 = vmul.f32 1.442695, %v534_v16 }
 0x139   : > { %v947_v61 = vadd.f32 %v1616_v33, %v946_v62  ;;  %v767_v62 = vmul.f32 1.442695, %v530_v24  ;;  %3889 = vst [vmem:[#allocation78_spill] sm:$0xff] %v3040_v22  ;;  %v3050_v60 = vpop.eup %1629 }
 0x13a   : > { %v921_v46 = vadd.f32 %v3024_v12, %v920_v34  ;;  %3890 = vst [vmem:[#allocation79_spill] sm:$0xff] %v3050_v60  ;;  %v3055_v41 = vpop.eup %1631 }
 0x13b   : > { %v951_v18 = vsel %vm3017_vm2, %v1616_v33, %v947_v61  ;;  %v1685_v33 = vld [vmem:[%s1936_s22 + $0x398] sm:$0xff]  ;;  %1635 = vpow2.f32 %v767_v62  ;;  %3891 = vst [vmem:[#allocation80_spill] sm:$0xff] %v3055_v41 }
 0x13c   : > { %v3033_v10 = vsel %vm953_vm3, %v955_v49, %v951_v18  ;;  %v536_v61 = vsub.f32 %v1685_v33, %v2540_v0  ;;  %v771_v49 = vmul.f32 1.442695, %v532_v15  ;;  %v922_v24 = vadd.f32 %v3031_v35, %v921_v46  ;;  %v1687_v15 = vld [vmem:[%s1936_s22 + $0x3b8] sm:$0xff]  ;;  %v3060_v46 = vpop.eup %1633  ;;  %v1688_v33 = vld [vmem:[%s1936_s22 + $0x3c8] sm:$0xff] }
 0x13d   : > { %v957_v30 = vmul.f32 %v2422_v31, %v3033_v10  ;;  %v1686_v31 = vld [vmem:[%s1936_s22 + $0x3a8] sm:$0xff]  ;;  %v540_v34 = vsub.f32 %v1687_v15, %v2540_v0  ;;  %3892 = vst [vmem:[#allocation81_spill] sm:$0xff] %v3060_v46 }
 0x13e   : > { %v538_v51 = vsub.f32 %v1686_v31, %v2540_v0  ;;  %v923_v18 = vadd.f32 %v3040_v22, %v922_v24  ;;  %1637 = vpow2.f32 %v771_v49  ;;  %v779_v32 = vmul.f32 1.442695, %v536_v61  ;;  %v1689_v22 = vld [vmem:[%s1936_s22 + $0x3d8] sm:$0xff] }
 0x13f   : > { %1099 = vst [vmem:[%s3046_s16] sm:$0xff] %v957_v30  ;;  %v542_v31 = vsub.f32 %v1688_v33, %v2540_v0  ;;  %1639 = vpow2.f32 %v775_v40  ;;  %v544_v15 = vsub.f32 %v1689_v22, %v2540_v0  ;;  %v787_v49 = vmul.f32 1.442695, %v540_v34 }
 0x140   : > { %v924_v30 = vadd.f32 %v3050_v60, %v923_v18  ;;  %v783_v16 = vmul.f32 1.442695, %v538_v51  ;;  %1641 = vpow2.f32 %v779_v32  ;;  %v1690_v60 = vld [vmem:[%s1936_s22 + $0x3e8] sm:$0xff] }
 0x141   : > { %v3065_v24 = vpop.eup %1635  ;;  %v546_v35 = vsub.f32 %v1690_v60, %v2540_v0  ;;  %v791_v40 = vmul.f32 1.442695, %v542_v31  ;;  %v795_v22 = vmul.f32 1.442695, %v544_v15 }
 0x142   : > { %v925_v62 = vadd.f32 %v3055_v41, %v924_v30  ;;  %1643 = vpow2.f32 %v783_v16  ;;  %v1691_v30 = vld [vmem:[%s1936_s22 + $0x3f8] sm:$0xff] }
 0x143   : > { %v548_v41 = vsub.f32 %v1691_v30, %v2540_v0  ;;  %1645 = vpow2.f32 %v787_v49 }
 0x144   : > { %v926_v61 = vadd.f32 %v3060_v46, %v925_v62  ;;  %v3070_v18 = vpop.eup %1637  ;;  %1647 = vpow2.f32 %v791_v40  ;;  %v799_v62 = vmul.f32 1.442695, %v546_v35 }
 0x145   : > { %v3075_v33 = vpop.eup %1639  ;;  %1649 = vpow2.f32 %v795_v22  ;;  %v803_v31 = vmul.f32 1.442695, %v548_v41  ;;  %v973_v22 = vmul.f32 %v2425_v42, %v3033_v10  ;;  %v981_v42 = vmul.f32 %v2449_v11, %v3033_v10  ;;  %v3893_v11 = vld [vmem:[#allocation8_spill] sm:$0xff] }
 0x146   : > { %v927_v51 = vadd.f32 %v3065_v24, %v926_v61  ;;  %v3080_v32 = vpop.eup %1641  ;;  %1651 = vpow2.f32 %v799_v62  ;;  %v975_v62 = vmul.f32 %v2429_v39, %v3033_v10  ;;  %v983_v39 = vmul.f32 %v2456_v59, %v3033_v10  ;;  %v3894_v59 = vld [vmem:[#allocation9_spill] sm:$0xff] }
 0x147   : > { %1653 = vpow2.f32 %v803_v31  ;;  %1101 = vst [vmem:[%s3046_s16 + $0x10] sm:$0xff] %v973_v22  ;;  %v977_v31 = vmul.f32 %v2437_v14, %v3033_v10  ;;  %v985_v14 = vmul.f32 %v2461_v17, %v3033_v10  ;;  %v991_v22 = vmul.f32 %v3894_v59, %v3033_v10  ;;  %v3895_v17 = vld [vmem:[#allocation10_spill] sm:$0xff] }
 0x148   : > { %v928_v34 = vadd.f32 %v3070_v18, %v927_v51  ;;  %v3083_v60 = vpop.eup %1643  ;;  %1103 = vst [vmem:[%s3046_s16 + $0x20] sm:$0xff] %v975_v62 }
 0x149   : > { %v3086_v61 = vpop.eup %1645  ;;  %1105 = vst [vmem:[%s3046_s16 + $0x30] sm:$0xff] %v977_v31 }
 0x14a   : > { %v929_v46 = vadd.f32 %v3075_v33, %v928_v34  ;;  %v3089_v15 = vpop.eup %1647  ;;  %1109 = vst [vmem:[%s3046_s16 + $0x50] sm:$0xff] %v981_v42 }
 0x14b   : > { %v3092_v49 = vpop.eup %1649  ;;  %1111 = vst [vmem:[%s3046_s16 + $0x60] sm:$0xff] %v983_v39 }
 0x14c   : > { %v930_v16 = vadd.f32 %v3080_v32, %v929_v46  ;;  %v3095_v41 = vpop.eup %1651  ;;  %1113 = vst [vmem:[%s3046_s16 + $0x70] sm:$0xff] %v985_v14  ;;  %v3899_v14 = vld [vmem:[#allocation14_spill] sm:$0xff] }
 0x14d   : > { %v3098_v51 = vpop.eup %1653  ;;  %1119 = vst [vmem:[%s3046_s16 + $0xa0] sm:$0xff] %v991_v22 }
 0x14e   : > { %v931_v0 = vadd.f32 %v3083_v60, %v930_v16 }
 0x150   : > { %v932_v35 = vadd.f32 %v3086_v61, %v931_v0  ;;  %v979_v0 = vmul.f32 %v2444_v26, %v3033_v10  ;;  %v987_v26 = vmul.f32 %v2468_v4, %v3033_v10  ;;  %v3896_v4 = vld [vmem:[#allocation11_spill] sm:$0xff] }
 0x151   : > { %v995_v31 = vmul.f32 %v3896_v4, %v3033_v10 }
 0x152   : > { %v933_v40 = vadd.f32 %v3089_v15, %v932_v35  ;;  %1107 = vst [vmem:[%s3046_s16 + $0x40] sm:$0xff] %v979_v0 }
 0x153   : > { %1115 = vst [vmem:[%s3046_s16 + $0x80] sm:$0xff] %v987_v26  ;;  %v3900_v26 = vld [vmem:[#allocation15_spill] sm:$0xff] }
 0x154   : > { %v934_v46 = vadd.f32 %v3092_v49, %v933_v40  ;;  %1123 = vst [vmem:[%s3046_s16 + $0xc0] sm:$0xff] %v995_v31  ;;  %v3905_v31 = vld [vmem:[#allocation20_spill] sm:$0xff] }
 0x156   : > { %v935_v30 = vadd.f32 %v3095_v41, %v934_v46  ;;  %v989_v46 = vmul.f32 %v3893_v11, %v3033_v10  ;;  %v1003_v11 = vmul.f32 %v3900_v26, %v3033_v10 }
 0x158   : > { %v936_v34 = vadd.f32 %v3098_v51, %v935_v30  ;;  %1117 = vst [vmem:[%s3046_s16 + $0x90] sm:$0xff] %v989_v46  ;;  %v3901_v46 = vld [vmem:[#allocation16_spill] sm:$0xff] }
 0x159   : > { %v1005_v59 = vmul.f32 %v3901_v46, %v3033_v10  ;;  %1131 = vst [vmem:[%s3046_s16 + $0x100] sm:$0xff] %v1003_v11  ;;  %v3908_v46 = vld [vmem:[#allocation23_spill] sm:$0xff] }
 0x15a   : > { %v937_v16 = vrot.slane %v936_v34, 4 }
 0x15b   : > { %1133 = vst [vmem:[%s3046_s16 + $0x110] sm:$0xff] %v1005_v59  ;;  %v1019_v59 = vmul.f32 %v3908_v46, %v3033_v10  ;;  %v3912_v46 = vld [vmem:[#allocation36_spill] sm:$0xff] }
 0x15c   : > { %v938_v35 = vadd.f32 %v937_v16, %v936_v34  ;;  %v993_v34 = vmul.f32 %v3895_v17, %v3033_v10  ;;  %v3897_v16 = vld [vmem:[#allocation12_spill] sm:$0xff]  ;;  %v3903_v17 = vld [vmem:[#allocation18_spill] sm:$0xff] }
 0x15d   : > { %v997_v0 = vmul.f32 %v3897_v16, %v3033_v10  ;;  %v1013_v16 = vmul.f32 %v3905_v31, %v3033_v10  ;;  %1147 = vst [vmem:[%s3046_s16 + $0x180] sm:$0xff] %v1019_v59 }
 0x15e   : > { %v939_v40 = vrot.slane %v938_v35, 2  ;;  %1121 = vst [vmem:[%s3046_s16 + $0xb0] sm:$0xff] %v993_v34  ;;  %v1009_v34 = vmul.f32 %v3903_v17, %v3033_v10  ;;  %v1021_v17 = vmul.f32 %v2559_v27, %v3033_v10  ;;  %v3910_v27 = vld [vmem:[#allocation30_spill] sm:$0xff] }
 0x15f   : > { %1125 = vst [vmem:[%s3046_s16 + $0xd0] sm:$0xff] %v997_v0 }
 0x160   : > { %v940_v30 = vadd.f32 %v939_v40, %v938_v35  ;;  %v3898_v35 = vld [vmem:[#allocation13_spill] sm:$0xff]  ;;  %v1001_v40 = vmul.f32 %v3899_v14, %v3033_v10  ;;  %1137 = vst [vmem:[%s3046_s16 + $0x130] sm:$0xff] %v1009_v34  ;;  %v1023_v34 = vmul.f32 %v2566_v7, %v3033_v10  ;;  %v1029_v7 = vmul.f32 %v3910_v27, %v3033_v10 }
 0x161   : > { %v999_v39 = vmul.f32 %v3898_v35, %v3033_v10  ;;  %v3906_v35 = vld [vmem:[#allocation21_spill] sm:$0xff]  ;;  %1141 = vst [vmem:[%s3046_s16 + $0x150] sm:$0xff] %v1013_v16 }
 0x162   : > { %v941_v62 = vrot.slane %v940_v30, 1  ;;  %1129 = vst [vmem:[%s3046_s16 + $0xf0] sm:$0xff] %v1001_v40  ;;  %v3907_v40 = vld [vmem:[#allocation22_spill] sm:$0xff] }
 0x163   : > { %1127 = vst [vmem:[%s3046_s16 + $0xe0] sm:$0xff] %v999_v39  ;;  %v1015_v39 = vmul.f32 %v3906_v35, %v3033_v10  ;;  %v1017_v26 = vmul.f32 %v3907_v40, %v3033_v10 }
 0x164   : > { %v942_v42 = vadd.f32 %v941_v62, %v940_v30  ;;  %v3902_v30 = vld [vmem:[#allocation17_spill] sm:$0xff]  ;;  %v3904_v62 = vld [vmem:[#allocation19_spill] sm:$0xff]  ;;  %1149 = vst [vmem:[%s3046_s16 + $0x190] sm:$0xff] %v1021_v17  ;;  %v3914_v17 = vld [vmem:[#allocation56_spill] sm:$0xff] }
 0x165   : > { %v1007_v22 = vmul.f32 %v3902_v30, %v3033_v10  ;;  %v1011_v4 = vmul.f32 %v3904_v62, %v3033_v10  ;;  %1143 = vst [vmem:[%s3046_s16 + $0x160] sm:$0xff] %v1015_v39 }
 0x166   : > { %1655 = vrcp.f32 %v942_v42  ;;  %vm963_vm4 = vweird.f32 %v942_v42  ;;  %v969_v11 = vand.u32 2147483648, %v942_v42  ;;  %1145 = vst [vmem:[%s3046_s16 + $0x170] sm:$0xff] %v1017_v26  ;;  %v3911_v26 = vld [vmem:[#allocation35_spill] sm:$0xff] }
 0x167   : > { %1135 = vst [vmem:[%s3046_s16 + $0x120] sm:$0xff] %v1007_v22  ;;  %v967_v22 = vand.u32 2147483647, %v942_v42 }
 0x168   : > { %1139 = vst [vmem:[%s3046_s16 + $0x140] sm:$0xff] %v1011_v4  ;;  %v1025_v4 = vmul.f32 %v2571_v5, %v3033_v10  ;;  %v970_v31 = vor.u32 1.1754944e-38, %v969_v11  ;;  %v1031_v5 = vmul.f32 %v2589_v1, %v3033_v10 }
 0x169   : > { %vm968_vm7 = vcmp.eq.f32.partialorder %v967_v22, 8.507059e+37  ;;  %1151 = vst [vmem:[%s3046_s16 + $0x1a0] sm:$0xff] %v1023_v34  ;;  %v3913_v22 = vld [vmem:[#allocation54_spill] sm:$0xff] }
 0x16a   : > { %1153 = vst [vmem:[%s3046_s16 + $0x1b0] sm:$0xff] %v1025_v4  ;;  %v3915_v34 = vld [vmem:[#allocation58_spill] sm:$0xff]  ;;  %v3917_v4 = vld [vmem:[#allocation32_spill] sm:$0xff] }
 0x16b   : > { %1157 = vst [vmem:[%s3046_s16 + $0x1d0] sm:$0xff] %v1029_v7  ;;  %v3920_v7 = vld [vmem:[#allocation64_spill] sm:$0xff] }
 0x16c   : > { %v1656_v0 = vpop.eup %1655  ;;  %1159 = vst [vmem:[%s3046_s16 + $0x1e0] sm:$0xff] %v1031_v5 }
 0x16d   : > { %v959_v14 = vmul.f32 %v1656_v0, %v942_v42  ;;  %vm964_vm5 = vweird.f32 %v1656_v0  ;;  %v3909_v42 = vld [vmem:[#allocation24_spill] sm:$0xff] }
 0x16e   : > { %vm965_vm6 = vmor %vm963_vm4, %vm964_vm5  ;;  %v1027_v16 = vmul.f32 %v3909_v42, %v3033_v10  ;;  %v3918_v42 = vld [vmem:[#allocation62_spill] sm:$0xff] }
 0x16f   : > { %v960_v30 = vsub.f32 1.0, %v959_v14  ;;  %v1033_v14 = vmul.f32 %v2594_v28, %v3033_v10 }
 0x170   : > { %1155 = vst [vmem:[%s3046_s16 + $0x1c0] sm:$0xff] %v1027_v16 }
 0x171   : > { %v961_v62 = vmul.f32 %v1656_v0, %v960_v30  ;;  %1161 = vst [vmem:[%s3046_s16 + $0x1f0] sm:$0xff] %v1033_v14 }
 0x173   : > { %v962_v35 = vadd.f32 %v1656_v0, %v961_v62  ;;  %v3916_v62 = vld [vmem:[#allocation60_spill] sm:$0xff] }
 0x175   : > { %v966_v39 = vsel %vm965_vm6, %v1656_v0, %v962_v35  ;;  %v3919_v35 = vld [vmem:[#allocation39_spill] sm:$0xff] }
 0x176   : > { %v3192_v40 = vsel %vm968_vm7, %v970_v31, %v966_v39  ;;  %v1035_v31 = vmul.f32 %v3917_v4, %v3033_v10  ;;  %v1037_v27 = vmul.f32 %v3919_v35, %v3033_v10  ;;  %v3921_v39 = vld [vmem:[#allocation40_spill] sm:$0xff]  ;;  %v3941_v4 = vld [vmem:[#allocation38_spill] sm:$0xff]  ;;  %v3943_v35 = vld [vmem:[#allocation41_spill] sm:$0xff] }
 0x177   : > { %v972_v11 = vmul.f32 %v3911_v26, %v3192_v40  ;;  %v974_v59 = vmul.f32 %v3912_v46, %v3192_v40  ;;  %v976_v1 = vmul.f32 %v2614_v2, %v3192_v40  ;;  %v978_v0 = vmul.f32 %v2621_v43, %v3192_v40  ;;  %v3922_v26 = vld [vmem:[#allocation66_spill] sm:$0xff]  ;;  %v3923_v46 = vld [vmem:[#allocation25_spill] sm:$0xff] }
 0x178   : > { %v980_v28 = vmul.f32 %v2632_v47, %v3192_v40  ;;  %v982_v30 = vmul.f32 %v2643_v21, %v3192_v40  ;;  %v984_v2 = vmul.f32 %v2654_v9, %v3192_v40  ;;  %v986_v43 = vmul.f32 %v2665_v19, %v3192_v40  ;;  %1163 = vst [vmem:[%s3046_s16 + $0x200] sm:$0xff] %v1035_v31 }
 0x179   : > { %1100 = vst [vmem:[%s3046_s16 + $0x8] sm:$0xff] %v972_v11  ;;  %v988_v47 = vmul.f32 %v2676_v13, %v3192_v40  ;;  %v990_v21 = vmul.f32 %v2687_v54, %v3192_v40  ;;  %v992_v9 = vmul.f32 %v2698_v38, %v3192_v40  ;;  %v994_v19 = vmul.f32 %v2709_v50, %v3192_v40 }
 0x17a   : > { %1102 = vst [vmem:[%s3046_s16 + $0x18] sm:$0xff] %v974_v59  ;;  %v996_v13 = vmul.f32 %v2720_v52, %v3192_v40  ;;  %v998_v54 = vmul.f32 %v2731_v36, %v3192_v40  ;;  %v1000_v38 = vmul.f32 %v2742_v29, %v3192_v40  ;;  %v1002_v50 = vmul.f32 %v2753_v45, %v3192_v40 }
 0x17b   : > { %1104 = vst [vmem:[%s3046_s16 + $0x28] sm:$0xff] %v976_v1  ;;  %v1004_v52 = vmul.f32 %v2764_v57, %v3192_v40  ;;  %v1006_v36 = vmul.f32 %v2775_v25, %v3192_v40  ;;  %v1008_v29 = vmul.f32 %v2786_v23, %v3192_v40  ;;  %v1010_v45 = vmul.f32 %v2797_v8, %v3192_v40  ;;  %v3924_v1 = vld [vmem:[#allocation67_spill] sm:$0xff] }
 0x17c   : > { %1106 = vst [vmem:[%s3046_s16 + $0x38] sm:$0xff] %v978_v0  ;;  %v1012_v57 = vmul.f32 %v2808_v3, %v3192_v40  ;;  %v1014_v25 = vmul.f32 %v2819_v6, %v3192_v40  ;;  %v1016_v23 = vmul.f32 %v2830_v63, %v3192_v40  ;;  %v1018_v8 = vmul.f32 %v2841_v37, %v3192_v40 }
 0x17d   : > { %1108 = vst [vmem:[%s3046_s16 + $0x48] sm:$0xff] %v980_v28  ;;  %v1020_v3 = vmul.f32 %v2852_v48, %v3192_v40  ;;  %v1022_v6 = vmul.f32 %v2863_v56, %v3192_v40  ;;  %v1024_v63 = vmul.f32 %v2874_v20, %v3192_v40  ;;  %v1026_v37 = vmul.f32 %v2885_v58, %v3192_v40  ;;  %v3925_v28 = vld [vmem:[#allocation26_spill] sm:$0xff] }
 0x17e   : > { %1110 = vst [vmem:[%s3046_s16 + $0x58] sm:$0xff] %v982_v30  ;;  %v1028_v48 = vmul.f32 %v3913_v22, %v3192_v40  ;;  %v1030_v56 = vmul.f32 %v3914_v17, %v3192_v40  ;;  %v1032_v20 = vmul.f32 %v3915_v34, %v3192_v40  ;;  %v1034_v58 = vmul.f32 %v3916_v62, %v3192_v40  ;;  %v3937_v22 = vld [vmem:[#allocation34_spill] sm:$0xff]  ;;  %v3939_v34 = vld [vmem:[#allocation37_spill] sm:$0xff]  ;;  %v3940_v62 = vld [vmem:[#allocation75_spill] sm:$0xff] }
 0x17f   : > { %1112 = vst [vmem:[%s3046_s16 + $0x68] sm:$0xff] %v984_v2  ;;  %v1036_v16 = vmul.f32 %v3918_v42, %v3192_v40  ;;  %v1038_v5 = vmul.f32 %v3920_v7, %v3192_v40  ;;  %v1039_v14 = vmul.f32 %v3921_v39, %v3033_v10  ;;  %v1040_v11 = vmul.f32 %v3922_v26, %v3192_v40  ;;  %v3926_v2 = vld [vmem:[#allocation68_spill] sm:$0xff]  ;;  %v3938_v17 = vld [vmem:[#allocation74_spill] sm:$0xff]  ;;  %v3945_v26 = vld [vmem:[#allocation43_spill] sm:$0xff] }
 0x180   : > { %1114 = vst [vmem:[%s3046_s16 + $0x78] sm:$0xff] %v986_v43  ;;  %v1041_v59 = vmul.f32 %v3923_v46, %v3033_v10  ;;  %v1042_v0 = vmul.f32 %v3924_v1, %v3192_v40  ;;  %v1043_v30 = vmul.f32 %v3925_v28, %v3033_v10  ;;  %v1044_v43 = vmul.f32 %v3926_v2, %v3192_v40  ;;  %v3942_v42 = vld [vmem:[#allocation76_spill] sm:$0xff]  ;;  %v3947_v1 = vld [vmem:[#allocation45_spill] sm:$0xff] }
 0x181   : > { %1116 = vst [vmem:[%s3046_s16 + $0x88] sm:$0xff] %v988_v47  ;;  %v3927_v47 = vld [vmem:[#allocation27_spill] sm:$0xff]  ;;  %v1059_v31 = vmul.f32 %v3941_v4, %v3033_v10  ;;  %v1062_v7 = vmul.f32 %v3006_v44, %v3192_v40  ;;  %v1066_v44 = vmul.f32 %v3014_v53, %v3192_v40  ;;  %v3946_v46 = vld [vmem:[#allocation44_spill] sm:$0xff]  ;;  %v3948_v28 = vld [vmem:[#allocation77_spill] sm:$0xff] }
 0x182   : > { %1118 = vst [vmem:[%s3046_s16 + $0x98] sm:$0xff] %v990_v21  ;;  %v1045_v21 = vmul.f32 %v3927_v47, %v3033_v10  ;;  %v1070_v53 = vmul.f32 %v3948_v28, %v3192_v40  ;;  %v3951_v47 = vld [vmem:[#allocation47_spill] sm:$0xff]  ;;  %v3964_v4 = vld [vmem:[#allocation61_spill] sm:$0xff] }
 0x183   : > { %1120 = vst [vmem:[%s3046_s16 + $0xa8] sm:$0xff] %v992_v9  ;;  %v3928_v9 = vld [vmem:[#allocation69_spill] sm:$0xff] }
 0x184   : > { %1122 = vst [vmem:[%s3046_s16 + $0xb8] sm:$0xff] %v994_v19  ;;  %v1046_v19 = vmul.f32 %v3928_v9, %v3192_v40  ;;  %v3952_v9 = vld [vmem:[#allocation79_spill] sm:$0xff] }
 0x185   : > { %1124 = vst [vmem:[%s3046_s16 + $0xc8] sm:$0xff] %v996_v13  ;;  %v3929_v13 = vld [vmem:[#allocation28_spill] sm:$0xff] }
 0x186   : > { %1126 = vst [vmem:[%s3046_s16 + $0xd8] sm:$0xff] %v998_v54  ;;  %v1047_v54 = vmul.f32 %v3929_v13, %v3033_v10  ;;  %v3953_v13 = vld [vmem:[#allocation48_spill] sm:$0xff] }
 0x187   : > { %1128 = vst [vmem:[%s3046_s16 + $0xe8] sm:$0xff] %v1000_v38  ;;  %v3930_v38 = vld [vmem:[#allocation70_spill] sm:$0xff] }
 0x188   : > { %1130 = vst [vmem:[%s3046_s16 + $0xf8] sm:$0xff] %v1002_v50  ;;  %v1048_v50 = vmul.f32 %v3930_v38, %v3192_v40  ;;  %v3954_v38 = vld [vmem:[#allocation80_spill] sm:$0xff] }
 0x189   : > { %1132 = vst [vmem:[%s3046_s16 + $0x108] sm:$0xff] %v1004_v52  ;;  %v3931_v52 = vld [vmem:[#allocation29_spill] sm:$0xff] }
 0x18a   : > { %1134 = vst [vmem:[%s3046_s16 + $0x118] sm:$0xff] %v1006_v36  ;;  %v1049_v36 = vmul.f32 %v3931_v52, %v3033_v10  ;;  %v3955_v52 = vld [vmem:[#allocation49_spill] sm:$0xff] }
 0x18b   : > { %1136 = vst [vmem:[%s3046_s16 + $0x128] sm:$0xff] %v1008_v29  ;;  %v3932_v29 = vld [vmem:[#allocation71_spill] sm:$0xff] }
 0x18c   : > { %1138 = vst [vmem:[%s3046_s16 + $0x138] sm:$0xff] %v1010_v45  ;;  %v1050_v45 = vmul.f32 %v3932_v29, %v3192_v40  ;;  %v3956_v29 = vld [vmem:[#allocation81_spill] sm:$0xff] }
 0x18d   : > { %1140 = vst [vmem:[%s3046_s16 + $0x148] sm:$0xff] %v1012_v57  ;;  %v3933_v57 = vld [vmem:[#allocation31_spill] sm:$0xff] }
 0x18e   : > { %1142 = vst [vmem:[%s3046_s16 + $0x158] sm:$0xff] %v1014_v25  ;;  %v1051_v25 = vmul.f32 %v3933_v57, %v3033_v10  ;;  %v3957_v57 = vld [vmem:[#allocation50_spill] sm:$0xff] }
 0x18f   : > { %1144 = vst [vmem:[%s3046_s16 + $0x168] sm:$0xff] %v1016_v23  ;;  %v3934_v23 = vld [vmem:[#allocation72_spill] sm:$0xff] }
 0x190   : > { %1146 = vst [vmem:[%s3046_s16 + $0x178] sm:$0xff] %v1018_v8  ;;  %v1052_v8 = vmul.f32 %v3934_v23, %v3192_v40  ;;  %v1080_v23 = vmul.f32 %v3065_v24, %v3192_v40  ;;  %v1084_v24 = vmul.f32 %v3075_v33, %v3192_v40  ;;  %v1088_v33 = vmul.f32 %v3083_v60, %v3192_v40 }
 0x191   : > { %1148 = vst [vmem:[%s3046_s16 + $0x188] sm:$0xff] %v1020_v3  ;;  %v3935_v3 = vld [vmem:[#allocation33_spill] sm:$0xff]  ;;  %v1092_v60 = vmul.f32 %v3089_v15, %v3192_v40 }
 0x192   : > { %1150 = vst [vmem:[%s3046_s16 + $0x198] sm:$0xff] %v1022_v6  ;;  %v1053_v6 = vmul.f32 %v3935_v3, %v3033_v10  ;;  %v3966_v15 = vld [vmem:[#allocation65_spill] sm:$0xff] }
 0x193   : > { %1152 = vst [vmem:[%s3046_s16 + $0x1a8] sm:$0xff] %v1024_v63  ;;  %v3936_v63 = vld [vmem:[#allocation73_spill] sm:$0xff] }
 0x194   : > { %1154 = vst [vmem:[%s3046_s16 + $0x1b8] sm:$0xff] %v1026_v37  ;;  %v1054_v37 = vmul.f32 %v3936_v63, %v3192_v40  ;;  %v3959_v63 = vld [vmem:[#allocation52_spill] sm:$0xff] }
 0x195   : > { %1156 = vst [vmem:[%s3046_s16 + $0x1c8] sm:$0xff] %v1028_v48  ;;  %v1055_v48 = vmul.f32 %v3937_v22, %v3033_v10  ;;  %v3960_v22 = vld [vmem:[#allocation53_spill] sm:$0xff] }
 0x196   : > { %1158 = vst [vmem:[%s3046_s16 + $0x1d8] sm:$0xff] %v1030_v56  ;;  %v1056_v56 = vmul.f32 %v3938_v17, %v3192_v40  ;;  %v3961_v17 = vld [vmem:[#allocation55_spill] sm:$0xff] }
 0x197   : > { %1160 = vst [vmem:[%s3046_s16 + $0x1e8] sm:$0xff] %v1032_v20  ;;  %v1057_v20 = vmul.f32 %v3939_v34, %v3033_v10  ;;  %v3962_v34 = vld [vmem:[#allocation57_spill] sm:$0xff] }
 0x198   : > { %1162 = vst [vmem:[%s3046_s16 + $0x1f8] sm:$0xff] %v1034_v58  ;;  %v1058_v58 = vmul.f32 %v3940_v62, %v3192_v40  ;;  %v3963_v62 = vld [vmem:[#allocation59_spill] sm:$0xff] }
 0x199   : > { %1164 = vst [vmem:[%s3046_s16 + $0x208] sm:$0xff] %v1036_v16  ;;  %v1060_v16 = vmul.f32 %v3942_v42, %v3192_v40  ;;  %v3965_v42 = vld [vmem:[#allocation63_spill] sm:$0xff] }
 0x19a   : > { %1165 = vst [vmem:[%s3046_s16 + $0x210] sm:$0xff] %v1037_v27  ;;  %v1061_v27 = vmul.f32 %v3943_v35, %v3033_v10  ;;  %v1096_v35 = vmul.f32 %v3095_v41, %v3192_v40 }
 0x19b   : > { %1166 = vst [vmem:[%s3046_s16 + $0x218] sm:$0xff] %v1038_v5  ;;  %v3944_v5 = vld [vmem:[#allocation42_spill] sm:$0xff] }
 0x19c   : > { %1167 = vst [vmem:[%s3046_s16 + $0x220] sm:$0xff] %v1039_v14  ;;  %v1063_v39 = vmul.f32 %v3944_v5, %v3033_v10  ;;  %v1064_v14 = vmul.f32 %v3009_v55, %v3192_v40  ;;  %v1068_v55 = vmul.f32 %v3024_v12, %v3192_v40 }
 0x19d   : > { %1168 = vst [vmem:[%s3046_s16 + $0x228] sm:$0xff] %v1040_v11  ;;  %v1065_v11 = vmul.f32 %v3945_v26, %v3033_v10 }
 0x19e   : > { %1169 = vst [vmem:[%s3046_s16 + $0x230] sm:$0xff] %v1041_v59  ;;  %v1067_v59 = vmul.f32 %v3946_v46, %v3033_v10 }
 0x19f   : > { %1170 = vst [vmem:[%s3046_s16 + $0x238] sm:$0xff] %v1042_v0  ;;  %v1069_v0 = vmul.f32 %v3947_v1, %v3033_v10 }
 0x1a0   : > { %1171 = vst [vmem:[%s3046_s16 + $0x240] sm:$0xff] %v1043_v30  ;;  %v3949_v30 = vld [vmem:[#allocation46_spill] sm:$0xff] }
 0x1a1   : > { %1172 = vst [vmem:[%s3046_s16 + $0x248] sm:$0xff] %v1044_v43  ;;  %v1071_v2 = vmul.f32 %v3949_v30, %v3033_v10  ;;  %v3950_v43 = vld [vmem:[#allocation78_spill] sm:$0xff] }
 0x1a2   : > { %1173 = vst [vmem:[%s3046_s16 + $0x250] sm:$0xff] %v1045_v21  ;;  %v1072_v12 = vmul.f32 %v3950_v43, %v3192_v40  ;;  %v1073_v21 = vmul.f32 %v3951_v47, %v3033_v10 }
 0x1a3   : > { %1174 = vst [vmem:[%s3046_s16 + $0x258] sm:$0xff] %v1046_v19  ;;  %v1074_v19 = vmul.f32 %v3952_v9, %v3192_v40 }
 0x1a4   : > { %1175 = vst [vmem:[%s3046_s16 + $0x260] sm:$0xff] %v1047_v54  ;;  %v1075_v54 = vmul.f32 %v3953_v13, %v3033_v10 }
 0x1a5   : > { %1176 = vst [vmem:[%s3046_s16 + $0x268] sm:$0xff] %v1048_v50  ;;  %v1076_v50 = vmul.f32 %v3954_v38, %v3192_v40 }
 0x1a6   : > { %1177 = vst [vmem:[%s3046_s16 + $0x270] sm:$0xff] %v1049_v36  ;;  %v1077_v36 = vmul.f32 %v3955_v52, %v3033_v10 }
 0x1a7   : > { %1178 = vst [vmem:[%s3046_s16 + $0x278] sm:$0xff] %v1050_v45  ;;  %v1078_v45 = vmul.f32 %v3956_v29, %v3192_v40 }
 0x1a8   : > { %1179 = vst [vmem:[%s3046_s16 + $0x280] sm:$0xff] %v1051_v25  ;;  %v1079_v25 = vmul.f32 %v3957_v57, %v3033_v10 }
 0x1a9   : > { %1180 = vst [vmem:[%s3046_s16 + $0x288] sm:$0xff] %v1052_v8  ;;  %v3958_v8 = vld [vmem:[#allocation51_spill] sm:$0xff] }
 0x1aa   : > { %1181 = vst [vmem:[%s3046_s16 + $0x290] sm:$0xff] %v1053_v6  ;;  %v1081_v3 = vmul.f32 %v3958_v8, %v3033_v10  ;;  %v1082_v6 = vmul.f32 %v3070_v18, %v3192_v40  ;;  %v1086_v18 = vmul.f32 %v3080_v32, %v3192_v40  ;;  %v1090_v32 = vmul.f32 %v3086_v61, %v3192_v40 }
 0x1ab   : > { %1182 = vst [vmem:[%s3046_s16 + $0x298] sm:$0xff] %v1054_v37  ;;  %v1083_v37 = vmul.f32 %v3959_v63, %v3033_v10  ;;  %v1094_v61 = vmul.f32 %v3092_v49, %v3192_v40 }
 0x1ac   : > { %1183 = vst [vmem:[%s3046_s16 + $0x2a0] sm:$0xff] %v1055_v48  ;;  %v1085_v48 = vmul.f32 %v3960_v22, %v3033_v10 }
 0x1ad   : > { %1184 = vst [vmem:[%s3046_s16 + $0x2a8] sm:$0xff] %v1056_v56  ;;  %v1087_v56 = vmul.f32 %v3961_v17, %v3033_v10 }
 0x1ae   : > { %1185 = vst [vmem:[%s3046_s16 + $0x2b0] sm:$0xff] %v1057_v20  ;;  %v1089_v20 = vmul.f32 %v3962_v34, %v3033_v10 }
 0x1af   : > { %1186 = vst [vmem:[%s3046_s16 + $0x2b8] sm:$0xff] %v1058_v58  ;;  %v1091_v58 = vmul.f32 %v3963_v62, %v3033_v10 }
 0x1b0   : > { %1187 = vst [vmem:[%s3046_s16 + $0x2c0] sm:$0xff] %v1059_v31  ;;  %v1093_v31 = vmul.f32 %v3964_v4, %v3033_v10 }
 0x1b1   : > { %1188 = vst [vmem:[%s3046_s16 + $0x2c8] sm:$0xff] %v1060_v16  ;;  %v1095_v16 = vmul.f32 %v3965_v42, %v3033_v10 }
 0x1b2   : > { %1189 = vst [vmem:[%s3046_s16 + $0x2d0] sm:$0xff] %v1061_v27  ;;  %v1097_v27 = vmul.f32 %v3966_v15, %v3033_v10 }
 0x1b3   : > { %1190 = vst [vmem:[%s3046_s16 + $0x2d8] sm:$0xff] %v1062_v7  ;;  %v1098_v7 = vmul.f32 %v3098_v51, %v3192_v40 }
 0x1b4   : > { %1191 = vst [vmem:[%s3046_s16 + $0x2e0] sm:$0xff] %v1063_v39 }
 0x1b5   : > { %1192 = vst [vmem:[%s3046_s16 + $0x2e8] sm:$0xff] %v1064_v14 }
 0x1b6   : > { %1193 = vst [vmem:[%s3046_s16 + $0x2f0] sm:$0xff] %v1065_v11 }
 0x1b7   : > { %1194 = vst [vmem:[%s3046_s16 + $0x2f8] sm:$0xff] %v1066_v44 }
 0x1b8   : > { %1195 = vst [vmem:[%s3046_s16 + $0x300] sm:$0xff] %v1067_v59 }
 0x1b9   : > { %1196 = vst [vmem:[%s3046_s16 + $0x308] sm:$0xff] %v1068_v55 }
 0x1ba   : > { %1197 = vst [vmem:[%s3046_s16 + $0x310] sm:$0xff] %v1069_v0 }
 0x1bb   : > { %1198 = vst [vmem:[%s3046_s16 + $0x318] sm:$0xff] %v1070_v53 }
 0x1bc   : > { %1199 = vst [vmem:[%s3046_s16 + $0x320] sm:$0xff] %v1071_v2 }
 0x1bd   : > { %1200 = vst [vmem:[%s3046_s16 + $0x328] sm:$0xff] %v1072_v12 }
 0x1be   : > { %1201 = vst [vmem:[%s3046_s16 + $0x330] sm:$0xff] %v1073_v21 }
 0x1bf   : > { %1202 = vst [vmem:[%s3046_s16 + $0x338] sm:$0xff] %v1074_v19 }
 0x1c0   : > { %1203 = vst [vmem:[%s3046_s16 + $0x340] sm:$0xff] %v1075_v54 }
 0x1c1   : > { %1204 = vst [vmem:[%s3046_s16 + $0x348] sm:$0xff] %v1076_v50 }
 0x1c2   : > { %1205 = vst [vmem:[%s3046_s16 + $0x350] sm:$0xff] %v1077_v36 }
 0x1c3   : > { %1206 = vst [vmem:[%s3046_s16 + $0x358] sm:$0xff] %v1078_v45 }
 0x1c4   : > { %1207 = vst [vmem:[%s3046_s16 + $0x360] sm:$0xff] %v1079_v25 }
 0x1c5   : > { %1208 = vst [vmem:[%s3046_s16 + $0x368] sm:$0xff] %v1080_v23 }
 0x1c6   : > { %1209 = vst [vmem:[%s3046_s16 + $0x370] sm:$0xff] %v1081_v3 }
 0x1c7   : > { %1210 = vst [vmem:[%s3046_s16 + $0x378] sm:$0xff] %v1082_v6 }
 0x1c8   : > { %1211 = vst [vmem:[%s3046_s16 + $0x380] sm:$0xff] %v1083_v37 }
 0x1c9   : > { %1212 = vst [vmem:[%s3046_s16 + $0x388] sm:$0xff] %v1084_v24 }
 0x1ca   : > { %1213 = vst [vmem:[%s3046_s16 + $0x390] sm:$0xff] %v1085_v48 }
 0x1cb   : > { %1214 = vst [vmem:[%s3046_s16 + $0x398] sm:$0xff] %v1086_v18 }
 0x1cc   : > { %1215 = vst [vmem:[%s3046_s16 + $0x3a0] sm:$0xff] %v1087_v56 }
 0x1cd   : > { %1216 = vst [vmem:[%s3046_s16 + $0x3a8] sm:$0xff] %v1088_v33 }
 0x1ce   : > { %1217 = vst [vmem:[%s3046_s16 + $0x3b0] sm:$0xff] %v1089_v20 }
 0x1cf   : > { %1218 = vst [vmem:[%s3046_s16 + $0x3b8] sm:$0xff] %v1090_v32 }
 0x1d0   : > { %1219 = vst [vmem:[%s3046_s16 + $0x3c0] sm:$0xff] %v1091_v58 }
 0x1d1   : > { %1220 = vst [vmem:[%s3046_s16 + $0x3c8] sm:$0xff] %v1092_v60 }
 0x1d2   : > { %1221 = vst [vmem:[%s3046_s16 + $0x3d0] sm:$0xff] %v1093_v31 }
 0x1d3   : > { %1222 = vst [vmem:[%s3046_s16 + $0x3d8] sm:$0xff] %v1094_v61  ;;  %1234 = sbr.rel (!%p1870_p9) target bundleno = 504 (0x1f8), region = 32 }
 0x1d4   : > { %1223 = vst [vmem:[%s3046_s16 + $0x3e0] sm:$0xff] %v1095_v16 }
 0x1d5   : > { %1224 = vst [vmem:[%s3046_s16 + $0x3e8] sm:$0xff] %v1096_v35 }
 0x1d6   : > { %1225 = vst [vmem:[%s3046_s16 + $0x3f0] sm:$0xff] %v1097_v27 }
 0x1d7   : > { %1226 = vst [vmem:[%s3046_s16 + $0x3f8] sm:$0xff] %v1098_v7 }
 0x1d8   : > { %s3975_s5 = smov (!%p1237_p6, %s1236_s5), 2 }
 0x1d9   : > { %s1340_s11 = sshll.u32 %s3975_s5, 9 }
 0x1da   : > { %s1240_s13 = ssub.s32 1024, %s1340_s11 }
 0x1db   : > { %s1241_s23 = sshll.u32 %s1240_s13, 4 }
 0x1dc   : > { %1242 = vsyncadd %s1228_s26, %s1241_s23  ;;  %p3494_p13 = scmp.ne.s32.totalorder %s1340_s11, 0  ;;  %s1351_s24 = sshll.u32 %s1847_s10, 4 }
 0x1dd   : > { %s1245_s29 = scalar_lea.hbm %s3551_s1, %s1351_s24  ;;  %s1343_s30 = sshll.u32 %s3975_s5, 3 }
 0x1de   : > { %s1248_s2 = sshll.u32 %s3046_s16, 4  ;;  %s1250_s3 = sshll.u32 %s1245_s29, 4  ;;  %s3504_s2 = int_to_ptr.vmem [resolvable:$true] %s1248_s2  ;;  %s3506_s3 = int_to_ptr.hbm [resolvable:$true] %s1250_s3 }
 0x1df   : > { %s1353_s14 = sshll.u32 %s3975_s5, 13  ;;  %s1731_s20 = sshra.s32 %s3504_s2, 4  ;;  %s1732_s20 = int_to_ptr.vmem [resolvable:$true] %s1731_s20 }
 0x1e0   : > { %s1733_s28 = sshrl.u32 %s1353_s14, 4  ;;  %s1813_s10 = smov [#allocation5]  }
 0x1e1   : > { %s1738_s21 = scalar_lea.vmem %s1732_s20, %s1733_s28  ;;  %s1742_s22 = scalar_lea.vmem %s1813_s10, 2048 }
 0x1e2   : > { %p1739_p9 = scmp.ne.s32.totalorder %s1732_s20, %s1738_s21  ;;  %p1744_p8 = scmp.lt.s32.totalorder %s1742_s22, %s1738_s21 }
 0x1e4   : > { %p1740_p5 = pnand %p1739_p9, %p3494_p13 }
 0x1e6   : > { %p1741_p7 = pneg %p1740_p5 }
 0x1e8   : > { %p1746_p11 = pnand %p1744_p8, %p1741_p7 }
 0x1ea   : > { %1749 = shalt.err (!%p1746_p11)
}
 0x1eb   : > { %s1750_s16 = sshra.s32 %s3506_s3, 4  ;;  %s1761_s23 = scalar_lea.hbm %s3551_s1, 2560  ;;  %s1751_s16 = int_to_ptr.hbm [resolvable:$true] %s1750_s16 }
 0x1ec   : > { %s1757_s4 = scalar_lea.hbm %s1751_s16, %s1733_s28  ;;  %p1762_p2 = scmp.lt.s32.totalorder %s1751_s16, %s3551_s1 }
 0x1ed   : > { %p1758_p12 = scmp.ne.s32.totalorder %s1751_s16, %s1757_s4  ;;  %p1763_p3 = scmp.lt.s32.totalorder %s1761_s23, %s1757_s4 }
 0x1ef   : > { %p1759_p0 = pnand %p1758_p12, %p3494_p13  ;;  %p1764_p4 = por %p1763_p3, %p1762_p2 }
 0x1f1   : > { %p1760_p1 = pneg %p1759_p0 }
 0x1f3   : > { %p1765_p6 = pnand %p1764_p4, %p1760_p1 }
 0x1f5   : > { %1768 = shalt.err (!%p1765_p6)
}
 0x1f6   : > { %s1814_s27 = smov 256   ;;  %s1815_s29 = smov 640  }
 0x1f7   : > { %1256 = dma.vmem_to_hbm [thread:$0]  (%p3494_p13), %s3504_s2, %s1353_s14, %s3506_s3, %s1228_s26, %s1814_s27, %s1815_s29, %s1343_s30  }
 0x1f8 PF: > { %p1360_p9 = scmp.ge.s32.totalorder %s1808_s9, 2  ;;  %s1265_s20 = sand.u32 1, %s1796_s6  }
 0x1f9   : > { %s1266_s28 = scalar_lea.sflag [#allocation4], %s1265_s20 }
 0x1fa   : > { %p1357_p5 = pnand %p1360_p9, %p1874_p10 }
 0x1fc   : > { %p1358_p7 = pneg %p1357_p5 }
 0x1fe   : > { %1791 = dma.done.wait (%p1358_p7), %s1266_s28, 16384  }
 0x1ff   : > { %1793 = vsyncadd (%p1358_p7), %s1266_s28, 4294950912  ;;  %p14_p8 = scmp.ge.s32.totalorder %s1851_s12, 5   ;;  %s3968_s6 = smov %s1800_s7 }
 0x200   : > { %s3969_s7 = smov %s1804_s8  ;;  %s3970_s8 = smov %s1863_s15 }
 0x201   : > { %s3971_s9 = smov %s1851_s12  ;;  %16 = sbr.rel (!%p14_p8) target bundleno = 5 (0x5), region = 69 }
 0x206   :  { %1272 = vsyncpa [#allocation3], 1 }
 0x207   :  { %1274 = vsyncpa [#allocation3 + $0x1], 1 }
 0x208   :  { %1275 = vsyncpa [#allocation4], 1 }
 0x209   :  { %1277 = vsyncpa [#allocation4 + $0x1], 1 }

</bundles_post_ra>
